<compile_context>
chip_gen: v7x
topology: tpu7x:2x2x1
jax: 0.10.0
libtpu: 0.0.40
codegen_flags: <defaults>
</compile_context>

<pallas_src>
import math
from functools import partial

import jax
import jax.numpy as jnp
from jax.experimental import pallas as pl
from jax.experimental.pallas import tpu as pltpu

LANE = 128


def _round_up(n, m):
    return (n + m - 1) // m * m


def _vmem_limit_bytes():
    """Generation-aware scoped-VMEM budget (v5e/v6e: 128 MiB, v7x: 64 MiB)."""
    try:
        cap = pltpu.get_tpu_info().vmem_capacity_bytes
    except Exception:  # conservative fallback if the query is unavailable
        cap = 64 * 1024 * 1024
    if cap >= 96 * 1024 * 1024:
        return 100 * 1024 * 1024          # v5e / v6e
    return 48 * 1024 * 1024               # v7x (leave compiler headroom)


def _pick_batch_tile(batch, t_pad):
    """Largest power-of-two batch tile with ~512 matmul rows per grid step."""
    target = max(1, 512 // max(t_pad, 1))
    bb = 1
    while bb * 2 <= min(batch, target):
        bb *= 2
    return bb


# --------------------------------------------------------------------------
# Generic fused linear (x @ W + b), M-tiled.  Used once for the (batch
# independent) position half of the unify projection.
# --------------------------------------------------------------------------
def _linear_kernel(x_ref, w_ref, b_ref, o_ref):
    o_ref[...] = (
        jnp.dot(x_ref[...].astype(w_ref.dtype), w_ref[...],
                preferred_element_type=jnp.float32)
        + b_ref[...]
    )


def linear(x, w, b, *, vmem_limit, tm=256):
    M, K = x.shape
    N = w.shape[1]
    tm = min(M, tm)
    return pl.pallas_call(
        _linear_kernel,
        grid=(pl.cdiv(M, tm),),
        in_specs=[
            pl.BlockSpec((tm, K), lambda i: (i, 0)),
            pl.BlockSpec((K, N), lambda i: (0, 0), pipeline_mode=pl.Buffered(1)),
            pl.BlockSpec((1, N), lambda i: (0, 0), pipeline_mode=pl.Buffered(1)),
        ],
        out_specs=pl.BlockSpec((tm, N), lambda i: (i, 0)),
        out_shape=jax.ShapeDtypeStruct((M, N), jnp.float32),
        compiler_params=pltpu.CompilerParams(
            dimension_semantics=("parallel",),
            vmem_limit_bytes=vmem_limit,
        ),
    )(x, w, b)


# --------------------------------------------------------------------------
# Fused patch-embed + unify projection + (precomputed) position contribution:
#   h = (patches @ W_patch + b_patch) @ Wu_pe + (pos_table @ Wu_pos + b_unify)
# Batch-tiled; matmuls see M = bb*T rows.
# --------------------------------------------------------------------------
def _embed_kernel(x_ref, wpe_ref, bpe_ref, wu_ref, posc_ref, o_ref):
    bb, t, dp = x_ref.shape
    ep = o_ref.shape[-1]
    x = x_ref[...].reshape(bb * t, dp)
    pe = jnp.dot(x.astype(wpe_ref.dtype), wpe_ref[...],
                 preferred_element_type=jnp.float32) + bpe_ref[...]
    h = jnp.dot(pe.astype(wu_ref.dtype), wu_ref[...],
                preferred_element_type=jnp.float32)
    o_ref[...] = h.reshape(bb, t, ep) + posc_ref[...]


def embed(patches, w_patch, b_patch, w_unify_pe, pos_contrib, *, bb, vmem_limit):
    Bp, T, Dp = patches.shape
    Ep = w_unify_pe.shape[1]
    return pl.pallas_call(
        _embed_kernel,
        grid=(Bp // bb,),
        in_specs=[
            pl.BlockSpec((bb, T, Dp), lambda i: (i, 0, 0)),
            pl.BlockSpec(w_patch.shape, lambda i: (0, 0),
                         pipeline_mode=pl.Buffered(1)),
            pl.BlockSpec(b_patch.shape, lambda i: (0, 0),
                         pipeline_mode=pl.Buffered(1)),
            pl.BlockSpec(w_unify_pe.shape, lambda i: (0, 0),
                         pipeline_mode=pl.Buffered(1)),
            pl.BlockSpec(pos_contrib.shape, lambda i: (0, 0),
                         pipeline_mode=pl.Buffered(1)),
        ],
        out_specs=pl.BlockSpec((bb, T, Ep), lambda i: (i, 0, 0)),
        out_shape=jax.ShapeDtypeStruct((Bp, T, Ep), jnp.float32),
        compiler_params=pltpu.CompilerParams(
            dimension_semantics=("parallel",),
            vmem_limit_bytes=vmem_limit,
        ),
    )(patches, w_patch, b_patch, w_unify_pe, pos_contrib)


# --------------------------------------------------------------------------
# All transformer blocks in one pallas_call.
#   grid = (batch_tiles, depth); weights stacked [depth, ...] and streamed per
#   layer (double-buffered); activation carried across layers in VMEM scratch.
# --------------------------------------------------------------------------
def _layernorm(x, g, b, lane_mask, n_true, eps=1e-5):
    # Padded lanes of x are exactly zero by construction, so the mean needs no
    # input mask; the deviation is masked so padded lanes don't corrupt var.
    inv_n = 1.0 / n_true
    mu = jnp.sum(x, axis=-1, keepdims=True) * inv_n
    d = x - mu
    if lane_mask is not None:
        d = d * lane_mask
    var = jnp.sum(d * d, axis=-1, keepdims=True) * inv_n
    return d * jax.lax.rsqrt(var + eps) * g + b


def _blocks_kernel(
    x_ref, wqkv_ref, bqkv_ref, wo_ref, bo_ref, g1_ref, b1_ref,
    wf1_ref, bf1_ref, wf2_ref, bf2_ref, g2_ref, b2_ref,
    o_ref, carry_ref, *, heads, e_true, dh_true, t_true,
):
    layer = pl.program_id(1)
    n_layers = pl.num_programs(1)

    @pl.when(layer == 0)
    def _():
        carry_ref[...] = x_ref[...]

    x3 = carry_ref[...]                              # [bb, Tp, Ep] f32
    bb, tp, ep = x3.shape
    x = x3.reshape(bb * tp, ep)                      # batch folded into M
    dh_p = ep // heads
    scale = 1.0 / math.sqrt(dh_true)

    # Fused QKV projection: one full-width MXU matmul with M = bb*Tp.
    qkv = jnp.dot(x.astype(wqkv_ref.dtype), wqkv_ref[0],
                  preferred_element_type=jnp.float32) + bqkv_ref[0]
    # 1/sqrt(dh) folded into q (cheaper than scaling the [.., T, T] scores).
    q = (qkv[:, :ep] * scale).astype(jnp.bfloat16).reshape(bb, tp, ep)
    k = qkv[:, ep:2 * ep].astype(jnp.bfloat16).reshape(bb, tp, ep)
    v = qkv[:, 2 * ep:].astype(jnp.bfloat16).reshape(bb, tp, ep)

    if tp > t_true:  # static: mask padded key positions out of the softmax
        key_ok = jax.lax.broadcasted_iota(jnp.int32, (1, 1, tp), 2) < t_true
        key_bias = jnp.where(key_ok, 0.0, -1e30).astype(jnp.float32)
    else:
        key_bias = None

    # Per-head attention on lane slices (no major-axis transposes); each
    # einsum has a single leading batch dim, as in the flash-attention kernel.
    head_outs = []
    for h in range(heads):
        lo = h * dh_p
        qh = q[:, :, lo:lo + dh_p]
        kh = k[:, :, lo:lo + dh_p]
        vh = v[:, :, lo:lo + dh_p]
        s = jnp.einsum("bqd,bkd->bqk", qh, kh,
                       preferred_element_type=jnp.float32)
        if key_bias is not None:
            s = s + key_bias
        s = s - jnp.max(s, axis=-1, keepdims=True)
        p = jnp.exp(s)
        p = p * pl.reciprocal(jnp.sum(p, axis=-1, keepdims=True), approx=True)
        head_outs.append(
            jnp.einsum("bqk,bkd->bqd", p.astype(jnp.bfloat16), vh,
                       preferred_element_type=jnp.float32))
    attn = jnp.concatenate(head_outs, axis=-1).reshape(bb * tp, ep)
    att = jnp.dot(attn.astype(wo_ref.dtype), wo_ref[0],
                  preferred_element_type=jnp.float32) + bo_ref[0]

    if ep > e_true:  # static: lane mask only needed when E is not 128-aligned
        lane_mask = (jax.lax.broadcasted_iota(jnp.int32, (1, ep), 1) < e_true
                     ).astype(jnp.float32)
    else:
        lane_mask = None

    # Post-norm residual + ReLU FFN + post-norm residual (M = bb*Tp matmuls).
    x1 = _layernorm(att + x, g1_ref[0], b1_ref[0], lane_mask, e_true)
    hidden = jnp.maximum(
        jnp.dot(x1.astype(wf1_ref.dtype), wf1_ref[0],
                preferred_element_type=jnp.float32) + bf1_ref[0],
        0.0,
    )
    ffo = jnp.dot(hidden.astype(wf2_ref.dtype), wf2_ref[0],
                  preferred_element_type=jnp.float32) + bf2_ref[0]
    x2 = _layernorm(ffo + x1, g2_ref[0], b2_ref[0], lane_mask, e_true)

    carry_ref[...] = x2.reshape(bb, tp, ep)

    @pl.when(layer == n_layers - 1)
    def _():
        o_ref[...] = carry_ref[...]


_BLOCK_PARAM_ORDER = (
    "wqkv", "bqkv", "wo", "bo", "g1", "b1",
    "wf1", "bf1", "wf2", "bf2", "g2", "b2",
)


def transformer_blocks(x, blocks, *, heads, e_true, t_true, bb, vmem_limit):
    Bp, Tp, Ep = x.shape
    depth = blocks["wqkv"].shape[0]
    dh_true = e_true // heads

    x_map = lambda bt, l: (bt, 0, 0)
    w_map = lambda bt, l: (l, 0, 0)
    weight_specs = [
        pl.BlockSpec((1,) + tuple(blocks[name].shape[1:]), w_map)
        for name in _BLOCK_PARAM_ORDER
    ]
    return pl.pallas_call(
        partial(_blocks_kernel, heads=heads, e_true=e_true,
                dh_true=dh_true, t_true=t_true),
        grid=(Bp // bb, depth),
        in_specs=[pl.BlockSpec((bb, Tp, Ep), x_map)] + weight_specs,
        out_specs=pl.BlockSpec((bb, Tp, Ep), x_map),
        out_shape=jax.ShapeDtypeStruct((Bp, Tp, Ep), jnp.float32),
        scratch_shapes=[pltpu.VMEM((bb, Tp, Ep), jnp.float32)],
        compiler_params=pltpu.CompilerParams(
            dimension_semantics=("parallel", "arbitrary"),
            vmem_limit_bytes=vmem_limit,
        ),
    )(x, *[blocks[name] for name in _BLOCK_PARAM_ORDER])


# --------------------------------------------------------------------------
# Global average over the (masked) sequence + classifier head, batch-tiled.
# --------------------------------------------------------------------------
def _pool_classify_kernel(x_ref, w_ref, b_ref, o_ref, *, t_true):
    x = x_ref[...]                                   # [tb, Tp, Ep]
    tp = x.shape[1]
    if tp > t_true:  # static: padded tokens must not enter the mean
        row_ok = jax.lax.broadcasted_iota(jnp.int32, (1, tp, 1), 1) < t_true
        x = jnp.where(row_ok, x, 0.0)
    pooled = jnp.sum(x, axis=1) * (1.0 / t_true)     # [tb, Ep]
    o_ref[...] = (
        jnp.dot(pooled.astype(w_ref.dtype), w_ref[...],
                preferred_element_type=jnp.float32) + b_ref[...]
    )


def pool_classify(x, w, b, *, t_true, tb, vmem_limit):
    Bp, Tp, Ep = x.shape
    Cp = w.shape[1]
    return pl.pallas_call(
        partial(_pool_classify_kernel, t_true=t_true),
        grid=(Bp // tb,),
        in_specs=[
            pl.BlockSpec((tb, Tp, Ep), lambda i: (i, 0, 0)),
            pl.BlockSpec((Ep, Cp), lambda i: (0, 0),
                         pipeline_mode=pl.Buffered(1)),
            pl.BlockSpec((1, Cp), lambda i: (0, 0),
                         pipeline_mode=pl.Buffered(1)),
        ],
        out_specs=pl.BlockSpec((tb, Cp), lambda i: (i, 0)),
        out_shape=jax.ShapeDtypeStruct((Bp, Cp), jnp.float32),
        compiler_params=pltpu.CompilerParams(
            dimension_semantics=("parallel",),
            vmem_limit_bytes=vmem_limit,
        ),
    )(x, w, b)


# --------------------------------------------------------------------------
# Parameter init (deterministic, synthetic) and host-side padding/packing.
# --------------------------------------------------------------------------
def _dense(key, fin, fout, scale=0.02):
    kw, kb = jax.random.split(key)
    w = jax.random.normal(kw, (fin, fout), jnp.float32) * scale
    b = jax.random.normal(kb, (1, fout), jnp.float32) * scale
    return w, b


def init_block_params(key, emb, ff):
    ks = jax.random.split(key, 6)
    wq, bq = _dense(ks[0], emb, emb)
    wk, bk = _dense(ks[1], emb, emb)
    wv, bv = _dense(ks[2], emb, emb)
    wo, bo = _dense(ks[3], emb, emb)
    wf1, bf1 = _dense(ks[4], emb, ff * emb)
    wf2, bf2 = _dense(ks[5], ff * emb, emb)
    ones = jnp.ones((1, emb), jnp.float32)
    zeros = jnp.zeros((1, emb), jnp.float32)
    return dict(
        wq=wq, bq=bq, wk=wk, bk=bk, wv=wv, bv=bv, wo=wo, bo=bo,
        g1=ones, b1=zeros, wf1=wf1, bf1=bf1, wf2=wf2, bf2=bf2,
        g2=ones, b2=zeros,
    )


def init_params(key, channels, image_size, patch_size, emb, heads, ff, depth,
                nr_classes):
    patch_dim = channels * patch_size ** 2
    num_patches = (image_size // patch_size) ** 2
    keys = jax.random.split(key, 4 + depth)
    w_patch, b_patch = _dense(keys[0], patch_dim, emb)
    pos_table = jax.random.normal(keys[1], (num_patches, emb), jnp.float32) * 0.02
    w_unify, b_unify = _dense(keys[2], 2 * emb, emb)
    w_cls, b_cls = _dense(keys[3], emb, nr_classes)
    blocks = [init_block_params(keys[4 + i], emb, ff) for i in range(depth)]
    return dict(
        w_patch=w_patch, b_patch=b_patch, pos_table=pos_table,
        w_unify=w_unify, b_unify=b_unify, w_cls=w_cls, b_cls=b_cls,
        blocks=blocks,
    )


def _pad2(a, rows, cols):
    return jnp.pad(a, ((0, rows - a.shape[0]), (0, cols - a.shape[1])))


def _pack_block(bp, heads):
    E = bp["wq"].shape[0]
    dh = E // heads
    Ep = _round_up(E, LANE)
    assert Ep % heads == 0
    dh_p = Ep // heads
    FF = bp["wf1"].shape[1]
    FFp = _round_up(FF, LANE)

    def pad_qkv_cols(w):             # head h -> columns [h*dh_p, h*dh_p + dh)
        w3 = w.reshape(E, heads, dh)
        w3 = jnp.pad(w3, ((0, Ep - E), (0, 0), (0, dh_p - dh)))
        return w3.reshape(Ep, Ep)

    def pad_qkv_bias(b):
        b3 = b.reshape(1, heads, dh)
        b3 = jnp.pad(b3, ((0, 0), (0, 0), (0, dh_p - dh)))
        return b3.reshape(1, Ep)

    wqkv = jnp.concatenate(
        [pad_qkv_cols(bp["wq"]), pad_qkv_cols(bp["wk"]), pad_qkv_cols(bp["wv"])],
        axis=1,
    ).astype(jnp.bfloat16)
    bqkv = jnp.concatenate(
        [pad_qkv_bias(bp["bq"]), pad_qkv_bias(bp["bk"]), pad_qkv_bias(bp["bv"])],
        axis=1,
    )

    wo3 = bp["wo"].reshape(heads, dh, E)   # head h -> rows [h*dh_p, h*dh_p+dh)
    wo3 = jnp.pad(wo3, ((0, 0), (0, dh_p - dh), (0, Ep - E)))
    wo = wo3.reshape(Ep, Ep).astype(jnp.bfloat16)

    return dict(
        wqkv=wqkv, bqkv=bqkv, wo=wo, bo=_pad2(bp["bo"], 1, Ep),
        g1=_pad2(bp["g1"], 1, Ep), b1=_pad2(bp["b1"], 1, Ep),
        wf1=_pad2(bp["wf1"], Ep, FFp).astype(jnp.bfloat16),
        bf1=_pad2(bp["bf1"], 1, FFp),
        wf2=_pad2(bp["wf2"], FFp, Ep).astype(jnp.bfloat16),
        bf2=_pad2(bp["bf2"], 1, Ep),
        g2=_pad2(bp["g2"], 1, Ep), b2=_pad2(bp["b2"], 1, Ep),
    )


def pack_params(params, heads):
    D, E = params["w_patch"].shape
    Dp, Ep = _round_up(D, LANE), _round_up(E, LANE)
    C = params["w_cls"].shape[1]
    Cp = _round_up(C, LANE)
    T = params["pos_table"].shape[0]
    w_unify = params["w_unify"]                     # [2E, E]

    block_list = [_pack_block(bp, heads) for bp in params["blocks"]]
    blocks = {k: jnp.stack([b[k] for b in block_list], axis=0)
              for k in block_list[0]}               # each: [depth, ...]

    return dict(
        w_patch=_pad2(params["w_patch"], Dp, Ep).astype(jnp.bfloat16),
        b_patch=_pad2(params["b_patch"], 1, Ep),
        pos_table=_pad2(params["pos_table"], T, Ep),
        w_unify_pe=_pad2(w_unify[:E], Ep, Ep).astype(jnp.bfloat16),
        w_unify_pos=_pad2(w_unify[E:], Ep, Ep).astype(jnp.bfloat16),
        b_unify=_pad2(params["b_unify"], 1, Ep),
        w_cls=_pad2(params["w_cls"], Ep, Cp).astype(jnp.bfloat16),
        b_cls=_pad2(params["b_cls"], 1, Cp),
        blocks=blocks,
    )


# --------------------------------------------------------------------------
# Full forward pass.
# --------------------------------------------------------------------------
def vit_forward(x, packed, patch_size, heads, emb, nr_classes):
    # x is NCHW [B, C, H, W] (PyTorch convention).
    B, C, H, W = x.shape
    p = patch_size
    # einops 'b c (h p1) (w p2) -> b (h w) (p1 p2 c)'  (glue reshapes only)
    patches = x.reshape(B, C, H // p, p, W // p, p)
    patches = patches.transpose(0, 2, 4, 3, 5, 1)
    patches = patches.reshape(B, (H // p) * (W // p), p * p * C)
    _, T, D = patches.shape

    Dp = packed["w_patch"].shape[0]
    Tp = _round_up(T, 8)                 # sublane-aligned sequence length
    vmem_limit = _vmem_limit_bytes()

    # Batch tiling: fold several batch rows into the matmul M dimension.
    bb = _pick_batch_tile(B, Tp)
    Bp = _round_up(B, bb)
    if Bp > 8:
        Bp = _round_up(Bp, 8)            # allows an 8-aligned pool batch tile
    tb_pool = Bp if Bp <= 8 else max(bb, 8)

    patches_p = jnp.pad(patches, ((0, Bp - B), (0, 0), (0, Dp - D)))

    # Position half of the unify projection: batch independent, computed once
    # (Embedding(arange(T)) == first T rows of the table).
    pos_contrib = linear(packed["pos_table"][:T], packed["w_unify_pos"],
                         packed["b_unify"], vmem_limit=vmem_limit)

    # Fused patch-embed + unify (+ position contribution), batch-tiled.
    h = embed(patches_p, packed["w_patch"], packed["b_patch"],
              packed["w_unify_pe"], pos_contrib, bb=bb, vmem_limit=vmem_limit)

    if Tp != T:                          # zero-pad tokens; masked in-kernel
        h = jnp.pad(h, ((0, 0), (0, Tp - T), (0, 0)))

    # All transformer blocks in a single pallas_call (layer grid axis).
    h = transformer_blocks(h, packed["blocks"], heads=heads, e_true=emb,
                           t_true=T, bb=bb, vmem_limit=vmem_limit)

    # Mean over the true sequence + classifier (batch-tiled, lane-dense out).
    logits_p = pool_classify(h, packed["w_cls"], packed["b_cls"],
                             t_true=T, tb=tb_pool, vmem_limit=vmem_limit)
    return logits_p[:B, :nr_classes]


if __name__ == "__main__":
    # Small shapes consistent with the module's forward.
    BATCH, CHANNELS, IMAGE_SIZE, PATCH_SIZE = 2, 3, 16, 4
    EMB, HEADS, FF, DEPTH, NR_CLASSES = 32, 4, 2, 2, 2

    key = jax.random.PRNGKey(0)
    k_x, k_p = jax.random.split(key)
    x = jax.random.normal(k_x, (BATCH, CHANNELS, IMAGE_SIZE, IMAGE_SIZE),
                          jnp.float32)
    params = init_params(k_p, CHANNELS, IMAGE_SIZE, PATCH_SIZE, EMB, HEADS,
                         FF, DEPTH, NR_CLASSES)
    packed = pack_params(params, HEADS)

    fwd = jax.jit(lambda img, prm: vit_forward(
        img, prm, PATCH_SIZE, HEADS, EMB, NR_CLASSES))
    out = fwd(x, packed)
    out = jax.block_until_ready(out)
    assert out.shape == (BATCH, NR_CLASSES)
    assert jnp.all(jnp.isfinite(out))
    print("KERNEL_OK")
</pallas_src>

<mosaic_0001>
module attributes {stable_mosaic.version = 11 : i64} {
  func.func @_linear_kernel(%arg0: i32, %arg1: memref<16x128xf32, #tpu.memory_space<vmem>>, %arg2: memref<128x128xbf16, #tpu.memory_space<vmem>>, %arg3: memref<1x128xf32, #tpu.memory_space<vmem>>, %arg4: memref<16x128xf32, #tpu.memory_space<vmem>>) attributes {dimension_semantics = [#tpu.dimension_semantics<parallel>], iteration_bounds = array<i64: 1>, scalar_prefetch = 0 : i64, scratch_operands = 0 : i64, tpu.core_type = #tpu.core_type<tc>, window_params = [{transform_indices = @transform_0, window_bounds = array<i64: 16, 128>}, {pipeline_mode = #tpu.pipeline_mode<synchronous>, transform_indices = @transform_1, window_bounds = array<i64: 128, 128>}, {pipeline_mode = #tpu.pipeline_mode<synchronous>, transform_indices = @transform_2, window_bounds = array<i64: 1, 128>}, {transform_indices = @transform_3, window_bounds = array<i64: 16, 128>}]} {
    %c0 = arith.constant 0 : index
    %c0_0 = arith.constant 0 : index
    %0 = vector.load %arg1[%c0, %c0_0] : memref<16x128xf32, #tpu.memory_space<vmem>>, vector<16x128xf32>
    %1 = arith.truncf %0 : vector<16x128xf32> to vector<16x128xbf16>
    %c0_1 = arith.constant 0 : index
    %c0_2 = arith.constant 0 : index
    %2 = vector.load %arg2[%c0_1, %c0_2] : memref<128x128xbf16, #tpu.memory_space<vmem>>, vector<128x128xbf16>
    %cst = arith.constant dense<0.000000e+00> : vector<16x128xf32>
    %3 = tpu.matmul %1, %2, %cst {dimension_numbers = #tpu.dot_dimension_numbers<[1], [0], [0], [1], [0, 0, 1, 1], [], []>} : vector<16x128xbf16>, vector<128x128xbf16>, vector<16x128xf32> -> vector<16x128xf32>
    %c0_3 = arith.constant 0 : index
    %c0_4 = arith.constant 0 : index
    %4 = vector.load %arg3[%c0_3, %c0_4] : memref<1x128xf32, #tpu.memory_space<vmem>>, vector<1x128xf32>
    %5 = vector.broadcast %4 : vector<1x128xf32> to vector<16x128xf32>
    %6 = arith.addf %3, %5 : vector<16x128xf32>
    %c0_5 = arith.constant 0 : index
    %c0_6 = arith.constant 0 : index
    %7 = vector.load %arg4[%c0_5, %c0_6] : memref<16x128xf32, #tpu.memory_space<vmem>>, vector<16x128xf32>
    tpu.vector_store %arg4[%c0_5, %c0_6], %6 {strides = array<i32>} : memref<16x128xf32, #tpu.memory_space<vmem>>, vector<16x128xf32>,
    return
  }
  func.func @transform_0(%arg0: i32) -> (i32, i32) {
    %c0_i32 = arith.constant 0 : i32
    %c0_i32_0 = arith.constant 0 : i32
    return %arg0, %c0_i32 : i32, i32
  }
  func.func @transform_1(%arg0: i32) -> (i32, i32) {
    %c0_i32 = arith.constant 0 : i32
    %c0_i32_0 = arith.constant 0 : i32
    %c0_i32_1 = arith.constant 0 : i32
    return %c0_i32, %c0_i32_0 : i32, i32
  }
  func.func @transform_2(%arg0: i32) -> (i32, i32) {
    %c0_i32 = arith.constant 0 : i32
    %c0_i32_0 = arith.constant 0 : i32
    %c0_i32_1 = arith.constant 0 : i32
    return %c0_i32, %c0_i32_0 : i32, i32
  }
  func.func @transform_3(%arg0: i32) -> (i32, i32) {
    %c0_i32 = arith.constant 0 : i32
    %c0_i32_0 = arith.constant 0 : i32
    return %arg0, %c0_i32 : i32, i32
  }
}

module attributes {stable_mosaic.version = 11 : i64} {
  func.func @_embed_kernel(%arg0: i32, %arg1: memref<2x16x128xf32, #tpu.memory_space<vmem>>, %arg2: memref<128x128xbf16, #tpu.memory_space<vmem>>, %arg3: memref<1x128xf32, #tpu.memory_space<vmem>>, %arg4: memref<128x128xbf16, #tpu.memory_space<vmem>>, %arg5: memref<16x128xf32, #tpu.memory_space<vmem>>, %arg6: memref<2x16x128xf32, #tpu.memory_space<vmem>>) attributes {dimension_semantics = [#tpu.dimension_semantics<parallel>], iteration_bounds = array<i64: 1>, scalar_prefetch = 0 : i64, scratch_operands = 0 : i64, tpu.core_type = #tpu.core_type<tc>, window_params = [{transform_indices = @transform_0, window_bounds = array<i64: 2, 16, 128>}, {pipeline_mode = #tpu.pipeline_mode<synchronous>, transform_indices = @transform_1, window_bounds = array<i64: 128, 128>}, {pipeline_mode = #tpu.pipeline_mode<synchronous>, transform_indices = @transform_2, window_bounds = array<i64: 1, 128>}, {pipeline_mode = #tpu.pipeline_mode<synchronous>, transform_indices = @transform_3, window_bounds = array<i64: 128, 128>}, {pipeline_mode = #tpu.pipeline_mode<synchronous>, transform_indices = @transform_4, window_bounds = array<i64: 16, 128>}, {transform_indices = @transform_5, window_bounds = array<i64: 2, 16, 128>}]} {
    %c0 = arith.constant 0 : index
    %c0_0 = arith.constant 0 : index
    %c0_1 = arith.constant 0 : index
    %0 = vector.load %arg1[%c0, %c0_0, %c0_1] : memref<2x16x128xf32, #tpu.memory_space<vmem>>, vector<2x16x128xf32>
    %1 = vector.shape_cast %0 : vector<2x16x128xf32> to vector<32x128xf32>
    %2 = arith.truncf %1 : vector<32x128xf32> to vector<32x128xbf16>
    %c0_2 = arith.constant 0 : index
    %c0_3 = arith.constant 0 : index
    %3 = vector.load %arg2[%c0_2, %c0_3] : memref<128x128xbf16, #tpu.memory_space<vmem>>, vector<128x128xbf16>
    %cst = arith.constant dense<0.000000e+00> : vector<32x128xf32>
    %4 = tpu.matmul %2, %3, %cst {dimension_numbers = #tpu.dot_dimension_numbers<[1], [0], [0], [1], [0, 0, 1, 1], [], []>} : vector<32x128xbf16>, vector<128x128xbf16>, vector<32x128xf32> -> vector<32x128xf32>
    %c0_4 = arith.constant 0 : index
    %c0_5 = arith.constant 0 : index
    %5 = vector.load %arg3[%c0_4, %c0_5] : memref<1x128xf32, #tpu.memory_space<vmem>>, vector<1x128xf32>
    %6 = vector.broadcast %5 : vector<1x128xf32> to vector<32x128xf32>
    %7 = arith.addf %4, %6 : vector<32x128xf32>
    %8 = arith.truncf %7 : vector<32x128xf32> to vector<32x128xbf16>
    %c0_6 = arith.constant 0 : index
    %c0_7 = arith.constant 0 : index
    %9 = vector.load %arg4[%c0_6, %c0_7] : memref<128x128xbf16, #tpu.memory_space<vmem>>, vector<128x128xbf16>
    %cst_8 = arith.constant dense<0.000000e+00> : vector<32x128xf32>
    %10 = tpu.matmul %8, %9, %cst_8 {dimension_numbers = #tpu.dot_dimension_numbers<[1], [0], [0], [1], [0, 0, 1, 1], [], []>} : vector<32x128xbf16>, vector<128x128xbf16>, vector<32x128xf32> -> vector<32x128xf32>
    %11 = vector.shape_cast %10 : vector<32x128xf32> to vector<2x16x128xf32>
    %c0_9 = arith.constant 0 : index
    %c0_10 = arith.constant 0 : index
    %12 = vector.load %arg5[%c0_9, %c0_10] : memref<16x128xf32, #tpu.memory_space<vmem>>, vector<16x128xf32>
    %13 = vector.shape_cast %12 : vector<16x128xf32> to vector<1x16x128xf32>
    %14 = vector.broadcast %13 : vector<1x16x128xf32> to vector<2x16x128xf32>
    %15 = arith.addf %11, %14 : vector<2x16x128xf32>
    %c0_11 = arith.constant 0 : index
    %c0_12 = arith.constant 0 : index
    %c0_13 = arith.constant 0 : index
    %16 = vector.load %arg6[%c0_11, %c0_12, %c0_13] : memref<2x16x128xf32, #tpu.memory_space<vmem>>, vector<2x16x128xf32>
    tpu.vector_store %arg6[%c0_11, %c0_12, %c0_13], %15 {strides = array<i32>} : memref<2x16x128xf32, #tpu.memory_space<vmem>>, vector<2x16x128xf32>,
    return
  }
  func.func @transform_0(%arg0: i32) -> (i32, i32, i32) {
    %c0_i32 = arith.constant 0 : i32
    %c0_i32_0 = arith.constant 0 : i32
    %c0_i32_1 = arith.constant 0 : i32
    return %arg0, %c0_i32, %c0_i32_0 : i32, i32, i32
  }
  func.func @transform_1(%arg0: i32) -> (i32, i32) {
    %c0_i32 = arith.constant 0 : i32
    %c0_i32_0 = arith.constant 0 : i32
    %c0_i32_1 = arith.constant 0 : i32
    return %c0_i32, %c0_i32_0 : i32, i32
  }
  func.func @transform_2(%arg0: i32) -> (i32, i32) {
    %c0_i32 = arith.constant 0 : i32
    %c0_i32_0 = arith.constant 0 : i32
    %c0_i32_1 = arith.constant 0 : i32
    return %c0_i32, %c0_i32_0 : i32, i32
  }
  func.func @transform_3(%arg0: i32) -> (i32, i32) {
    %c0_i32 = arith.constant 0 : i32
    %c0_i32_0 = arith.constant 0 : i32
    %c0_i32_1 = arith.constant 0 : i32
    return %c0_i32, %c0_i32_0 : i32, i32
  }
  func.func @transform_4(%arg0: i32) -> (i32, i32) {
    %c0_i32 = arith.constant 0 : i32
    %c0_i32_0 = arith.constant 0 : i32
    %c0_i32_1 = arith.constant 0 : i32
    return %c0_i32, %c0_i32_0 : i32, i32
  }
  func.func @transform_5(%arg0: i32) -> (i32, i32, i32) {
    %c0_i32 = arith.constant 0 : i32
    %c0_i32_0 = arith.constant 0 : i32
    %c0_i32_1 = arith.constant 0 : i32
    return %arg0, %c0_i32, %c0_i32_0 : i32, i32, i32
  }
}

module attributes {stable_mosaic.version = 11 : i64} {
  func.func @_blocks_kernel(%arg0: i32, %arg1: i32, %arg2: memref<2x16x128xf32, #tpu.memory_space<vmem>>, %arg3: memref<1x128x384xbf16, #tpu.memory_space<vmem>>, %arg4: memref<1x1x384xf32, #tpu.memory_space<vmem>>, %arg5: memref<1x128x128xbf16, #tpu.memory_space<vmem>>, %arg6: memref<1x1x128xf32, #tpu.memory_space<vmem>>, %arg7: memref<1x1x128xf32, #tpu.memory_space<vmem>>, %arg8: memref<1x1x128xf32, #tpu.memory_space<vmem>>, %arg9: memref<1x128x128xbf16, #tpu.memory_space<vmem>>, %arg10: memref<1x1x128xf32, #tpu.memory_space<vmem>>, %arg11: memref<1x128x128xbf16, #tpu.memory_space<vmem>>, %arg12: memref<1x1x128xf32, #tpu.memory_space<vmem>>, %arg13: memref<1x1x128xf32, #tpu.memory_space<vmem>>, %arg14: memref<1x1x128xf32, #tpu.memory_space<vmem>>, %arg15: memref<2x16x128xf32, #tpu.memory_space<vmem>>, %arg16: memref<2x16x128xf32, #tpu.memory_space<vmem>>) attributes {dimension_semantics = [#tpu.dimension_semantics<parallel>, #tpu.dimension_semantics<arbitrary>], iteration_bounds = array<i64: 1, 2>, scalar_prefetch = 0 : i64, scratch_operands = 1 : i64, tpu.core_type = #tpu.core_type<tc>, window_params = [{transform_indices = @transform_0, window_bounds = array<i64: 2, 16, 128>}, {transform_indices = @transform_1, window_bounds = array<i64: 1, 128, 384>}, {transform_indices = @transform_2, window_bounds = array<i64: 1, 1, 384>}, {transform_indices = @transform_3, window_bounds = array<i64: 1, 128, 128>}, {transform_indices = @transform_4, window_bounds = array<i64: 1, 1, 128>}, {transform_indices = @transform_5, window_bounds = array<i64: 1, 1, 128>}, {transform_indices = @transform_6, window_bounds = array<i64: 1, 1, 128>}, {transform_indices = @transform_7, window_bounds = array<i64: 1, 128, 128>}, {transform_indices = @transform_8, window_bounds = array<i64: 1, 1, 128>}, {transform_indices = @transform_9, window_bounds = array<i64: 1, 128, 128>}, {transform_indices = @transform_10, window_bounds = array<i64: 1, 1, 128>}, {transform_indices = @transform_11, window_bounds = array<i64: 1, 1, 128>}, {transform_indices = @transform_12, window_bounds = array<i64: 1, 1, 128>}, {transform_indices = @transform_13, window_bounds = array<i64: 2, 16, 128>}]} {
    %c0_i32 = arith.constant 0 : i32
    %0 = arith.cmpi eq, %arg1, %c0_i32 : i32
    %1 = arith.extui %0 : i1 to i32
    %c0_i32_0 = arith.constant 0 : i32
    %2 = arith.cmpi ne, %1, %c0_i32_0 : i32
    scf.if %2 {
      %c0_74 = arith.constant 0 : index
      %c0_75 = arith.constant 0 : index
      %c0_76 = arith.constant 0 : index
      %180 = vector.load %arg2[%c0_74, %c0_75, %c0_76] : memref<2x16x128xf32, #tpu.memory_space<vmem>>, vector<2x16x128xf32>
      %c0_77 = arith.constant 0 : index
      %c0_78 = arith.constant 0 : index
      %c0_79 = arith.constant 0 : index
      %181 = vector.load %arg16[%c0_77, %c0_78, %c0_79] : memref<2x16x128xf32, #tpu.memory_space<vmem>>, vector<2x16x128xf32>
      tpu.vector_store %arg16[%c0_77, %c0_78, %c0_79], %180 {strides = array<i32>} : memref<2x16x128xf32, #tpu.memory_space<vmem>>, vector<2x16x128xf32>,
    } else {
    }
    %c0 = arith.constant 0 : index
    %c0_1 = arith.constant 0 : index
    %c0_2 = arith.constant 0 : index
    %3 = vector.load %arg16[%c0, %c0_1, %c0_2] : memref<2x16x128xf32, #tpu.memory_space<vmem>>, vector<2x16x128xf32>
    %4 = vector.shape_cast %3 : vector<2x16x128xf32> to vector<32x128xf32>
    %5 = arith.truncf %4 : vector<32x128xf32> to vector<32x128xbf16>
    %c0_3 = arith.constant 0 : index
    %c0_4 = arith.constant 0 : index
    %c0_5 = arith.constant 0 : index
    %6 = vector.load %arg3[%c0_3, %c0_4, %c0_5] : memref<1x128x384xbf16, #tpu.memory_space<vmem>>, vector<1x128x384xbf16>
    %7 = vector.shape_cast %6 : vector<1x128x384xbf16> to vector<128x384xbf16>
    %cst = arith.constant dense<0.000000e+00> : vector<32x384xf32>
    %8 = tpu.matmul %5, %7, %cst {dimension_numbers = #tpu.dot_dimension_numbers<[1], [0], [0], [1], [0, 0, 1, 1], [], []>} : vector<32x128xbf16>, vector<128x384xbf16>, vector<32x384xf32> -> vector<32x384xf32>
    %c0_6 = arith.constant 0 : index
    %c0_7 = arith.constant 0 : index
    %c0_8 = arith.constant 0 : index
    %9 = vector.load %arg4[%c0_6, %c0_7, %c0_8] : memref<1x1x384xf32, #tpu.memory_space<vmem>>, vector<1x1x384xf32>
    %10 = vector.shape_cast %9 : vector<1x1x384xf32> to vector<1x384xf32>
    %11 = vector.broadcast %10 : vector<1x384xf32> to vector<32x384xf32>
    %12 = arith.addf %8, %11 : vector<32x384xf32>
    %13 = vector.extract_strided_slice %12 {offsets = [0, 0], sizes = [32, 128], strides = [1, 1]} : vector<32x384xf32> to vector<32x128xf32>
    %cst_9 = arith.constant 0.353553385 : f32
    %14 = vector.broadcast %cst_9 : f32 to vector<32x128xf32>
    %15 = arith.mulf %13, %14 : vector<32x128xf32>
    %16 = arith.truncf %15 : vector<32x128xf32> to vector<32x128xbf16>
    %17 = vector.shape_cast %16 : vector<32x128xbf16> to vector<2x16x128xbf16>
    %18 = vector.extract_strided_slice %12 {offsets = [0, 128], sizes = [32, 128], strides = [1, 1]} : vector<32x384xf32> to vector<32x128xf32>
    %19 = arith.truncf %18 : vector<32x128xf32> to vector<32x128xbf16>
    %20 = vector.shape_cast %19 : vector<32x128xbf16> to vector<2x16x128xbf16>
    %21 = vector.extract_strided_slice %12 {offsets = [0, 256], sizes = [32, 128], strides = [1, 1]} : vector<32x384xf32> to vector<32x128xf32>
    %22 = arith.truncf %21 : vector<32x128xf32> to vector<32x128xbf16>
    %23 = vector.shape_cast %22 : vector<32x128xbf16> to vector<2x16x128xbf16>
    %24 = vector.extract_strided_slice %17 {offsets = [0, 0, 0], sizes = [2, 16, 32], strides = [1, 1, 1]} : vector<2x16x128xbf16> to vector<2x16x32xbf16>
    %25 = vector.extract_strided_slice %20 {offsets = [0, 0, 0], sizes = [2, 16, 32], strides = [1, 1, 1]} : vector<2x16x128xbf16> to vector<2x16x32xbf16>
    %26 = vector.extract_strided_slice %23 {offsets = [0, 0, 0], sizes = [2, 16, 32], strides = [1, 1, 1]} : vector<2x16x128xbf16> to vector<2x16x32xbf16>
    "tpu.trace_start"() <{level = 10 : i32, message = "bqd,bkd->bqk"}> : () -> ()
    %cst_10 = arith.constant dense<0.000000e+00> : vector<2x16x16xf32>
    %27 = tpu.matmul %24, %25, %cst_10 {dimension_numbers = #tpu.dot_dimension_numbers<[2], [2], [1], [1], [0, 0, 0, 1, 1, 1], [0], [0]>} : vector<2x16x32xbf16>, vector<2x16x32xbf16>, vector<2x16x16xf32> -> vector<2x16x16xf32>
    "tpu.trace_stop"() : () -> ()
    %cst_11 = arith.constant dense<0xFF800000> : vector<2x16xf32>
    %28 = vector.multi_reduction <maximumf>, %27, %cst_11 [2] : vector<2x16x16xf32> to vector<2x16xf32>
    %29 = vector.shape_cast %28 : vector<2x16xf32> to vector<2x16x1xf32>
    %30 = vector.broadcast %29 : vector<2x16x1xf32> to vector<2x16x16xf32>
    %31 = arith.subf %27, %30 : vector<2x16x16xf32>
    %32 = math.exp %31 : vector<2x16x16xf32>
    %cst_12 = arith.constant dense<0.000000e+00> : vector<2x16xf32>
    %33 = vector.multi_reduction <add>, %32, %cst_12 [2] : vector<2x16x16xf32> to vector<2x16xf32>
    %34 = vector.shape_cast %33 : vector<2x16xf32> to vector<2x16x1xf32>
    %35 = tpu.reciprocal %34 {approx = true} : vector<2x16x1xf32> -> vector<2x16x1xf32>
    %36 = vector.broadcast %35 : vector<2x16x1xf32> to vector<2x16x16xf32>
    %37 = arith.mulf %32, %36 : vector<2x16x16xf32>
    %38 = arith.truncf %37 : vector<2x16x16xf32> to vector<2x16x16xbf16>
    "tpu.trace_start"() <{level = 10 : i32, message = "bqk,bkd->bqd"}> : () -> ()
    %cst_13 = arith.constant dense<0.000000e+00> : vector<2x16x32xf32>
    %39 = tpu.matmul %38, %26, %cst_13 {dimension_numbers = #tpu.dot_dimension_numbers<[2], [1], [1], [2], [0, 0, 0, 1, 1, 2], [0], [0]>} : vector<2x16x16xbf16>, vector<2x16x32xbf16>, vector<2x16x32xf32> -> vector<2x16x32xf32>
    "tpu.trace_stop"() : () -> ()
    %40 = vector.extract_strided_slice %17 {offsets = [0, 0, 32], sizes = [2, 16, 32], strides = [1, 1, 1]} : vector<2x16x128xbf16> to vector<2x16x32xbf16>
    %41 = vector.extract_strided_slice %20 {offsets = [0, 0, 32], sizes = [2, 16, 32], strides = [1, 1, 1]} : vector<2x16x128xbf16> to vector<2x16x32xbf16>
    %42 = vector.extract_strided_slice %23 {offsets = [0, 0, 32], sizes = [2, 16, 32], strides = [1, 1, 1]} : vector<2x16x128xbf16> to vector<2x16x32xbf16>
    "tpu.trace_start"() <{level = 10 : i32, message = "bqd,bkd->bqk"}> : () -> ()
    %cst_14 = arith.constant dense<0.000000e+00> : vector<2x16x16xf32>
    %43 = tpu.matmul %40, %41, %cst_14 {dimension_numbers = #tpu.dot_dimension_numbers<[2], [2], [1], [1], [0, 0, 0, 1, 1, 1], [0], [0]>} : vector<2x16x32xbf16>, vector<2x16x32xbf16>, vector<2x16x16xf32> -> vector<2x16x16xf32>
    "tpu.trace_stop"() : () -> ()
    %cst_15 = arith.constant dense<0xFF800000> : vector<2x16xf32>
    %44 = vector.multi_reduction <maximumf>, %43, %cst_15 [2] : vector<2x16x16xf32> to vector<2x16xf32>
    %45 = vector.shape_cast %44 : vector<2x16xf32> to vector<2x16x1xf32>
    %46 = vector.broadcast %45 : vector<2x16x1xf32> to vector<2x16x16xf32>
    %47 = arith.subf %43, %46 : vector<2x16x16xf32>
    %48 = math.exp %47 : vector<2x16x16xf32>
    %cst_16 = arith.constant dense<0.000000e+00> : vector<2x16xf32>
    %49 = vector.multi_reduction <add>, %48, %cst_16 [2] : vector<2x16x16xf32> to vector<2x16xf32>
    %50 = vector.shape_cast %49 : vector<2x16xf32> to vector<2x16x1xf32>
    %51 = tpu.reciprocal %50 {approx = true} : vector<2x16x1xf32> -> vector<2x16x1xf32>
    %52 = vector.broadcast %51 : vector<2x16x1xf32> to vector<2x16x16xf32>
    %53 = arith.mulf %48, %52 : vector<2x16x16xf32>
    %54 = arith.truncf %53 : vector<2x16x16xf32> to vector<2x16x16xbf16>
    "tpu.trace_start"() <{level = 10 : i32, message = "bqk,bkd->bqd"}> : () -> ()
    %cst_17 = arith.constant dense<0.000000e+00> : vector<2x16x32xf32>
    %55 = tpu.matmul %54, %42, %cst_17 {dimension_numbers = #tpu.dot_dimension_numbers<[2], [1], [1], [2], [0, 0, 0, 1, 1, 2], [0], [0]>} : vector<2x16x16xbf16>, vector<2x16x32xbf16>, vector<2x16x32xf32> -> vector<2x16x32xf32>
    "tpu.trace_stop"() : () -> ()
    %56 = vector.extract_strided_slice %17 {offsets = [0, 0, 64], sizes = [2, 16, 32], strides = [1, 1, 1]} : vector<2x16x128xbf16> to vector<2x16x32xbf16>
    %57 = vector.extract_strided_slice %20 {offsets = [0, 0, 64], sizes = [2, 16, 32], strides = [1, 1, 1]} : vector<2x16x128xbf16> to vector<2x16x32xbf16>
    %58 = vector.extract_strided_slice %23 {offsets = [0, 0, 64], sizes = [2, 16, 32], strides = [1, 1, 1]} : vector<2x16x128xbf16> to vector<2x16x32xbf16>
    "tpu.trace_start"() <{level = 10 : i32, message = "bqd,bkd->bqk"}> : () -> ()
    %cst_18 = arith.constant dense<0.000000e+00> : vector<2x16x16xf32>
    %59 = tpu.matmul %56, %57, %cst_18 {dimension_numbers = #tpu.dot_dimension_numbers<[2], [2], [1], [1], [0, 0, 0, 1, 1, 1], [0], [0]>} : vector<2x16x32xbf16>, vector<2x16x32xbf16>, vector<2x16x16xf32> -> vector<2x16x16xf32>
    "tpu.trace_stop"() : () -> ()
    %cst_19 = arith.constant dense<0xFF800000> : vector<2x16xf32>
    %60 = vector.multi_reduction <maximumf>, %59, %cst_19 [2] : vector<2x16x16xf32> to vector<2x16xf32>
    %61 = vector.shape_cast %60 : vector<2x16xf32> to vector<2x16x1xf32>
    %62 = vector.broadcast %61 : vector<2x16x1xf32> to vector<2x16x16xf32>
    %63 = arith.subf %59, %62 : vector<2x16x16xf32>
    %64 = math.exp %63 : vector<2x16x16xf32>
    %cst_20 = arith.constant dense<0.000000e+00> : vector<2x16xf32>
    %65 = vector.multi_reduction <add>, %64, %cst_20 [2] : vector<2x16x16xf32> to vector<2x16xf32>
    %66 = vector.shape_cast %65 : vector<2x16xf32> to vector<2x16x1xf32>
    %67 = tpu.reciprocal %66 {approx = true} : vector<2x16x1xf32> -> vector<2x16x1xf32>
    %68 = vector.broadcast %67 : vector<2x16x1xf32> to vector<2x16x16xf32>
    %69 = arith.mulf %64, %68 : vector<2x16x16xf32>
    %70 = arith.truncf %69 : vector<2x16x16xf32> to vector<2x16x16xbf16>
    "tpu.trace_start"() <{level = 10 : i32, message = "bqk,bkd->bqd"}> : () -> ()
    %cst_21 = arith.constant dense<0.000000e+00> : vector<2x16x32xf32>
    %71 = tpu.matmul %70, %58, %cst_21 {dimension_numbers = #tpu.dot_dimension_numbers<[2], [1], [1], [2], [0, 0, 0, 1, 1, 2], [0], [0]>} : vector<2x16x16xbf16>, vector<2x16x32xbf16>, vector<2x16x32xf32> -> vector<2x16x32xf32>
    "tpu.trace_stop"() : () -> ()
    %72 = vector.extract_strided_slice %17 {offsets = [0, 0, 96], sizes = [2, 16, 32], strides = [1, 1, 1]} : vector<2x16x128xbf16> to vector<2x16x32xbf16>
    %73 = vector.extract_strided_slice %20 {offsets = [0, 0, 96], sizes = [2, 16, 32], strides = [1, 1, 1]} : vector<2x16x128xbf16> to vector<2x16x32xbf16>
    %74 = vector.extract_strided_slice %23 {offsets = [0, 0, 96], sizes = [2, 16, 32], strides = [1, 1, 1]} : vector<2x16x128xbf16> to vector<2x16x32xbf16>
    "tpu.trace_start"() <{level = 10 : i32, message = "bqd,bkd->bqk"}> : () -> ()
    %cst_22 = arith.constant dense<0.000000e+00> : vector<2x16x16xf32>
    %75 = tpu.matmul %72, %73, %cst_22 {dimension_numbers = #tpu.dot_dimension_numbers<[2], [2], [1], [1], [0, 0, 0, 1, 1, 1], [0], [0]>} : vector<2x16x32xbf16>, vector<2x16x32xbf16>, vector<2x16x16xf32> -> vector<2x16x16xf32>
    "tpu.trace_stop"() : () -> ()
    %cst_23 = arith.constant dense<0xFF800000> : vector<2x16xf32>
    %76 = vector.multi_reduction <maximumf>, %75, %cst_23 [2] : vector<2x16x16xf32> to vector<2x16xf32>
    %77 = vector.shape_cast %76 : vector<2x16xf32> to vector<2x16x1xf32>
    %78 = vector.broadcast %77 : vector<2x16x1xf32> to vector<2x16x16xf32>
    %79 = arith.subf %75, %78 : vector<2x16x16xf32>
    %80 = math.exp %79 : vector<2x16x16xf32>
    %cst_24 = arith.constant dense<0.000000e+00> : vector<2x16xf32>
    %81 = vector.multi_reduction <add>, %80, %cst_24 [2] : vector<2x16x16xf32> to vector<2x16xf32>
    %82 = vector.shape_cast %81 : vector<2x16xf32> to vector<2x16x1xf32>
    %83 = tpu.reciprocal %82 {approx = true} : vector<2x16x1xf32> -> vector<2x16x1xf32>
    %84 = vector.broadcast %83 : vector<2x16x1xf32> to vector<2x16x16xf32>
    %85 = arith.mulf %80, %84 : vector<2x16x16xf32>
    %86 = arith.truncf %85 : vector<2x16x16xf32> to vector<2x16x16xbf16>
    "tpu.trace_start"() <{level = 10 : i32, message = "bqk,bkd->bqd"}> : () -> ()
    %cst_25 = arith.constant dense<0.000000e+00> : vector<2x16x32xf32>
    %87 = tpu.matmul %86, %74, %cst_25 {dimension_numbers = #tpu.dot_dimension_numbers<[2], [1], [1], [2], [0, 0, 0, 1, 1, 2], [0], [0]>} : vector<2x16x16xbf16>, vector<2x16x32xbf16>, vector<2x16x32xf32> -> vector<2x16x32xf32>
    "tpu.trace_stop"() : () -> ()
    %88 = tpu.concatenate %39, %55, %71, %87 in 2 : vector<2x16x32xf32>, vector<2x16x32xf32>, vector<2x16x32xf32>, vector<2x16x32xf32> -> vector<2x16x128xf32>
    %89 = vector.shape_cast %88 : vector<2x16x128xf32> to vector<32x128xf32>
    %90 = arith.truncf %89 : vector<32x128xf32> to vector<32x128xbf16>
    %c0_26 = arith.constant 0 : index
    %c0_27 = arith.constant 0 : index
    %c0_28 = arith.constant 0 : index
    %91 = vector.load %arg5[%c0_26, %c0_27, %c0_28] : memref<1x128x128xbf16, #tpu.memory_space<vmem>>, vector<1x128x128xbf16>
    %92 = vector.shape_cast %91 : vector<1x128x128xbf16> to vector<128x128xbf16>
    %cst_29 = arith.constant dense<0.000000e+00> : vector<32x128xf32>
    %93 = tpu.matmul %90, %92, %cst_29 {dimension_numbers = #tpu.dot_dimension_numbers<[1], [0], [0], [1], [0, 0, 1, 1], [], []>} : vector<32x128xbf16>, vector<128x128xbf16>, vector<32x128xf32> -> vector<32x128xf32>
    %c0_30 = arith.constant 0 : index
    %c0_31 = arith.constant 0 : index
    %c0_32 = arith.constant 0 : index
    %94 = vector.load %arg6[%c0_30, %c0_31, %c0_32] : memref<1x1x128xf32, #tpu.memory_space<vmem>>, vector<1x1x128xf32>
    %95 = vector.shape_cast %94 : vector<1x1x128xf32> to vector<1x128xf32>
    %96 = vector.broadcast %95 : vector<1x128xf32> to vector<32x128xf32>
    %97 = arith.addf %93, %96 : vector<32x128xf32>
    %98 = tpu.iota {dimensions = array<i32: 1>} : vector<1x128xi32>
    %c32_i32 = arith.constant 32 : i32
    %99 = vector.broadcast %c32_i32 : i32 to vector<1x128xi32>
    %100 = arith.cmpi slt, %98, %99 : vector<1x128xi32>
    %101 = arith.extui %100 : vector<1x128xi1> to vector<1x128xi32>
    %102 = arith.sitofp %101 : vector<1x128xi32> to vector<1x128xf32>
    %103 = arith.addf %97, %4 : vector<32x128xf32>
    %c0_33 = arith.constant 0 : index
    %c0_34 = arith.constant 0 : index
    %c0_35 = arith.constant 0 : index
    %104 = vector.load %arg7[%c0_33, %c0_34, %c0_35] : memref<1x1x128xf32, #tpu.memory_space<vmem>>, vector<1x1x128xf32>
    %105 = vector.shape_cast %104 : vector<1x1x128xf32> to vector<1x128xf32>
    %c0_36 = arith.constant 0 : index
    %c0_37 = arith.constant 0 : index
    %c0_38 = arith.constant 0 : index
    %106 = vector.load %arg8[%c0_36, %c0_37, %c0_38] : memref<1x1x128xf32, #tpu.memory_space<vmem>>, vector<1x1x128xf32>
    %107 = vector.shape_cast %106 : vector<1x1x128xf32> to vector<1x128xf32>
    %cst_39 = arith.constant dense<0.000000e+00> : vector<32xf32>
    %108 = vector.multi_reduction <add>, %103, %cst_39 [1] : vector<32x128xf32> to vector<32xf32>
    %109 = vector.shape_cast %108 : vector<32xf32> to vector<32x1xf32>
    %cst_40 = arith.constant 3.125000e-02 : f32
    %110 = vector.broadcast %cst_40 : f32 to vector<32x1xf32>
    %111 = arith.mulf %109, %110 : vector<32x1xf32>
    %112 = vector.broadcast %111 : vector<32x1xf32> to vector<32x128xf32>
    %113 = arith.subf %103, %112 : vector<32x128xf32>
    %114 = vector.broadcast %102 : vector<1x128xf32> to vector<32x128xf32>
    %115 = arith.mulf %113, %114 : vector<32x128xf32>
    %116 = arith.mulf %115, %115 : vector<32x128xf32>
    %cst_41 = arith.constant dense<0.000000e+00> : vector<32xf32>
    %117 = vector.multi_reduction <add>, %116, %cst_41 [1] : vector<32x128xf32> to vector<32xf32>
    %118 = vector.shape_cast %117 : vector<32xf32> to vector<32x1xf32>
    %cst_42 = arith.constant 3.125000e-02 : f32
    %119 = vector.broadcast %cst_42 : f32 to vector<32x1xf32>
    %120 = arith.mulf %118, %119 : vector<32x1xf32>
    %cst_43 = arith.constant 9.99999974E-6 : f32
    %121 = vector.broadcast %cst_43 : f32 to vector<32x1xf32>
    %122 = arith.addf %120, %121 : vector<32x1xf32>
    %123 = math.rsqrt %122 : vector<32x1xf32>
    %124 = vector.broadcast %123 : vector<32x1xf32> to vector<32x128xf32>
    %125 = arith.mulf %115, %124 : vector<32x128xf32>
    %126 = vector.broadcast %105 : vector<1x128xf32> to vector<32x128xf32>
    %127 = arith.mulf %125, %126 : vector<32x128xf32>
    %128 = vector.broadcast %107 : vector<1x128xf32> to vector<32x128xf32>
    %129 = arith.addf %127, %128 : vector<32x128xf32>
    %130 = arith.truncf %129 : vector<32x128xf32> to vector<32x128xbf16>
    %c0_44 = arith.constant 0 : index
    %c0_45 = arith.constant 0 : index
    %c0_46 = arith.constant 0 : index
    %131 = vector.load %arg9[%c0_44, %c0_45, %c0_46] : memref<1x128x128xbf16, #tpu.memory_space<vmem>>, vector<1x128x128xbf16>
    %132 = vector.shape_cast %131 : vector<1x128x128xbf16> to vector<128x128xbf16>
    %cst_47 = arith.constant dense<0.000000e+00> : vector<32x128xf32>
    %133 = tpu.matmul %130, %132, %cst_47 {dimension_numbers = #tpu.dot_dimension_numbers<[1], [0], [0], [1], [0, 0, 1, 1], [], []>} : vector<32x128xbf16>, vector<128x128xbf16>, vector<32x128xf32> -> vector<32x128xf32>
    %c0_48 = arith.constant 0 : index
    %c0_49 = arith.constant 0 : index
    %c0_50 = arith.constant 0 : index
    %134 = vector.load %arg10[%c0_48, %c0_49, %c0_50] : memref<1x1x128xf32, #tpu.memory_space<vmem>>, vector<1x1x128xf32>
    %135 = vector.shape_cast %134 : vector<1x1x128xf32> to vector<1x128xf32>
    %136 = vector.broadcast %135 : vector<1x128xf32> to vector<32x128xf32>
    %137 = arith.addf %133, %136 : vector<32x128xf32>
    %cst_51 = arith.constant 0.000000e+00 : f32
    %138 = vector.broadcast %cst_51 : f32 to vector<32x128xf32>
    %139 = arith.maximumf %137, %138 : vector<32x128xf32>
    %140 = arith.truncf %139 : vector<32x128xf32> to vector<32x128xbf16>
    %c0_52 = arith.constant 0 : index
    %c0_53 = arith.constant 0 : index
    %c0_54 = arith.constant 0 : index
    %141 = vector.load %arg11[%c0_52, %c0_53, %c0_54] : memref<1x128x128xbf16, #tpu.memory_space<vmem>>, vector<1x128x128xbf16>
    %142 = vector.shape_cast %141 : vector<1x128x128xbf16> to vector<128x128xbf16>
    %cst_55 = arith.constant dense<0.000000e+00> : vector<32x128xf32>
    %143 = tpu.matmul %140, %142, %cst_55 {dimension_numbers = #tpu.dot_dimension_numbers<[1], [0], [0], [1], [0, 0, 1, 1], [], []>} : vector<32x128xbf16>, vector<128x128xbf16>, vector<32x128xf32> -> vector<32x128xf32>
    %c0_56 = arith.constant 0 : index
    %c0_57 = arith.constant 0 : index
    %c0_58 = arith.constant 0 : index
    %144 = vector.load %arg12[%c0_56, %c0_57, %c0_58] : memref<1x1x128xf32, #tpu.memory_space<vmem>>, vector<1x1x128xf32>
    %145 = vector.shape_cast %144 : vector<1x1x128xf32> to vector<1x128xf32>
    %146 = vector.broadcast %145 : vector<1x128xf32> to vector<32x128xf32>
    %147 = arith.addf %143, %146 : vector<32x128xf32>
    %148 = arith.addf %147, %129 : vector<32x128xf32>
    %c0_59 = arith.constant 0 : index
    %c0_60 = arith.constant 0 : index
    %c0_61 = arith.constant 0 : index
    %149 = vector.load %arg13[%c0_59, %c0_60, %c0_61] : memref<1x1x128xf32, #tpu.memory_space<vmem>>, vector<1x1x128xf32>
    %150 = vector.shape_cast %149 : vector<1x1x128xf32> to vector<1x128xf32>
    %c0_62 = arith.constant 0 : index
    %c0_63 = arith.constant 0 : index
    %c0_64 = arith.constant 0 : index
    %151 = vector.load %arg14[%c0_62, %c0_63, %c0_64] : memref<1x1x128xf32, #tpu.memory_space<vmem>>, vector<1x1x128xf32>
    %152 = vector.shape_cast %151 : vector<1x1x128xf32> to vector<1x128xf32>
    %cst_65 = arith.constant dense<0.000000e+00> : vector<32xf32>
    %153 = vector.multi_reduction <add>, %148, %cst_65 [1] : vector<32x128xf32> to vector<32xf32>
    %154 = vector.shape_cast %153 : vector<32xf32> to vector<32x1xf32>
    %cst_66 = arith.constant 3.125000e-02 : f32
    %155 = vector.broadcast %cst_66 : f32 to vector<32x1xf32>
    %156 = arith.mulf %154, %155 : vector<32x1xf32>
    %157 = vector.broadcast %156 : vector<32x1xf32> to vector<32x128xf32>
    %158 = arith.subf %148, %157 : vector<32x128xf32>
    %159 = vector.broadcast %102 : vector<1x128xf32> to vector<32x128xf32>
    %160 = arith.mulf %158, %159 : vector<32x128xf32>
    %161 = arith.mulf %160, %160 : vector<32x128xf32>
    %cst_67 = arith.constant dense<0.000000e+00> : vector<32xf32>
    %162 = vector.multi_reduction <add>, %161, %cst_67 [1] : vector<32x128xf32> to vector<32xf32>
    %163 = vector.shape_cast %162 : vector<32xf32> to vector<32x1xf32>
    %cst_68 = arith.constant 3.125000e-02 : f32
    %164 = vector.broadcast %cst_68 : f32 to vector<32x1xf32>
    %165 = arith.mulf %163, %164 : vector<32x1xf32>
    %cst_69 = arith.constant 9.99999974E-6 : f32
    %166 = vector.broadcast %cst_69 : f32 to vector<32x1xf32>
    %167 = arith.addf %165, %166 : vector<32x1xf32>
    %168 = math.rsqrt %167 : vector<32x1xf32>
    %169 = vector.broadcast %168 : vector<32x1xf32> to vector<32x128xf32>
    %170 = arith.mulf %160, %169 : vector<32x128xf32>
    %171 = vector.broadcast %150 : vector<1x128xf32> to vector<32x128xf32>
    %172 = arith.mulf %170, %171 : vector<32x128xf32>
    %173 = vector.broadcast %152 : vector<1x128xf32> to vector<32x128xf32>
    %174 = arith.addf %172, %173 : vector<32x128xf32>
    %175 = vector.shape_cast %174 : vector<32x128xf32> to vector<2x16x128xf32>
    %c0_70 = arith.constant 0 : index
    %c0_71 = arith.constant 0 : index
    %c0_72 = arith.constant 0 : index
    %176 = vector.load %arg16[%c0_70, %c0_71, %c0_72] : memref<2x16x128xf32, #tpu.memory_space<vmem>>, vector<2x16x128xf32>
    tpu.vector_store %arg16[%c0_70, %c0_71, %c0_72], %175 {strides = array<i32>} : memref<2x16x128xf32, #tpu.memory_space<vmem>>, vector<2x16x128xf32>,
    %c1_i32 = arith.constant 1 : i32
    %177 = arith.cmpi eq, %arg1, %c1_i32 : i32
    %178 = arith.extui %177 : i1 to i32
    %c0_i32_73 = arith.constant 0 : i32
    %179 = arith.cmpi ne, %178, %c0_i32_73 : i32
    scf.if %179 {
      %c0_74 = arith.constant 0 : index
      %c0_75 = arith.constant 0 : index
      %c0_76 = arith.constant 0 : index
      %180 = vector.load %arg16[%c0_74, %c0_75, %c0_76] : memref<2x16x128xf32, #tpu.memory_space<vmem>>, vector<2x16x128xf32>
      %c0_77 = arith.constant 0 : index
      %c0_78 = arith.constant 0 : index
      %c0_79 = arith.constant 0 : index
      %181 = vector.load %arg15[%c0_77, %c0_78, %c0_79] : memref<2x16x128xf32, #tpu.memory_space<vmem>>, vector<2x16x128xf32>
      tpu.vector_store %arg15[%c0_77, %c0_78, %c0_79], %180 {strides = array<i32>} : memref<2x16x128xf32, #tpu.memory_space<vmem>>, vector<2x16x128xf32>,
    } else {
    }
    return
  }
  func.func @transform_0(%arg0: i32, %arg1: i32) -> (i32, i32, i32) {
    %c0_i32 = arith.constant 0 : i32
    %c0_i32_0 = arith.constant 0 : i32
    %c0_i32_1 = arith.constant 0 : i32
    return %arg0, %c0_i32, %c0_i32_0 : i32, i32, i32
  }
  func.func @transform_1(%arg0: i32, %arg1: i32) -> (i32, i32, i32) {
    %c0_i32 = arith.constant 0 : i32
    %c0_i32_0 = arith.constant 0 : i32
    %c0_i32_1 = arith.constant 0 : i32
    return %arg1, %c0_i32, %c0_i32_0 : i32, i32, i32
  }
  func.func @transform_2(%arg0: i32, %arg1: i32) -> (i32, i32, i32) {
    %c0_i32 = arith.constant 0 : i32
    %c0_i32_0 = arith.constant 0 : i32
    %c0_i32_1 = arith.constant 0 : i32
    return %arg1, %c0_i32, %c0_i32_0 : i32, i32, i32
  }
  func.func @transform_3(%arg0: i32, %arg1: i32) -> (i32, i32, i32) {
    %c0_i32 = arith.constant 0 : i32
    %c0_i32_0 = arith.constant 0 : i32
    %c0_i32_1 = arith.constant 0 : i32
    return %arg1, %c0_i32, %c0_i32_0 : i32, i32, i32
  }
  func.func @transform_4(%arg0: i32, %arg1: i32) -> (i32, i32, i32) {
    %c0_i32 = arith.constant 0 : i32
    %c0_i32_0 = arith.constant 0 : i32
    %c0_i32_1 = arith.constant 0 : i32
    return %arg1, %c0_i32, %c0_i32_0 : i32, i32, i32
  }
  func.func @transform_5(%arg0: i32, %arg1: i32) -> (i32, i32, i32) {
    %c0_i32 = arith.constant 0 : i32
    %c0_i32_0 = arith.constant 0 : i32
    %c0_i32_1 = arith.constant 0 : i32
    return %arg1, %c0_i32, %c0_i32_0 : i32, i32, i32
  }
  func.func @transform_6(%arg0: i32, %arg1: i32) -> (i32, i32, i32) {
    %c0_i32 = arith.constant 0 : i32
    %c0_i32_0 = arith.constant 0 : i32
    %c0_i32_1 = arith.constant 0 : i32
    return %arg1, %c0_i32, %c0_i32_0 : i32, i32, i32
  }
  func.func @transform_7(%arg0: i32, %arg1: i32) -> (i32, i32, i32) {
    %c0_i32 = arith.constant 0 : i32
    %c0_i32_0 = arith.constant 0 : i32
    %c0_i32_1 = arith.constant 0 : i32
    return %arg1, %c0_i32, %c0_i32_0 : i32, i32, i32
  }
  func.func @transform_8(%arg0: i32, %arg1: i32) -> (i32, i32, i32) {
    %c0_i32 = arith.constant 0 : i32
    %c0_i32_0 = arith.constant 0 : i32
    %c0_i32_1 = arith.constant 0 : i32
    return %arg1, %c0_i32, %c0_i32_0 : i32, i32, i32
  }
  func.func @transform_9(%arg0: i32, %arg1: i32) -> (i32, i32, i32) {
    %c0_i32 = arith.constant 0 : i32
    %c0_i32_0 = arith.constant 0 : i32
    %c0_i32_1 = arith.constant 0 : i32
    return %arg1, %c0_i32, %c0_i32_0 : i32, i32, i32
  }
  func.func @transform_10(%arg0: i32, %arg1: i32) -> (i32, i32, i32) {
    %c0_i32 = arith.constant 0 : i32
    %c0_i32_0 = arith.constant 0 : i32
    %c0_i32_1 = arith.constant 0 : i32
    return %arg1, %c0_i32, %c0_i32_0 : i32, i32, i32
  }
  func.func @transform_11(%arg0: i32, %arg1: i32) -> (i32, i32, i32) {
    %c0_i32 = arith.constant 0 : i32
    %c0_i32_0 = arith.constant 0 : i32
    %c0_i32_1 = arith.constant 0 : i32
    return %arg1, %c0_i32, %c0_i32_0 : i32, i32, i32
  }
  func.func @transform_12(%arg0: i32, %arg1: i32) -> (i32, i32, i32) {
    %c0_i32 = arith.constant 0 : i32
    %c0_i32_0 = arith.constant 0 : i32
    %c0_i32_1 = arith.constant 0 : i32
    return %arg1, %c0_i32, %c0_i32_0 : i32, i32, i32
  }
  func.func @transform_13(%arg0: i32, %arg1: i32) -> (i32, i32, i32) {
    %c0_i32 = arith.constant 0 : i32
    %c0_i32_0 = arith.constant 0 : i32
    %c0_i32_1 = arith.constant 0 : i32
    return %arg0, %c0_i32, %c0_i32_0 : i32, i32, i32
  }
}

module attributes {stable_mosaic.version = 11 : i64} {
  func.func @_pool_classify_kernel(%arg0: i32, %arg1: memref<2x16x128xf32, #tpu.memory_space<vmem>>, %arg2: memref<128x128xbf16, #tpu.memory_space<vmem>>, %arg3: memref<1x128xf32, #tpu.memory_space<vmem>>, %arg4: memref<2x128xf32, #tpu.memory_space<vmem>>) attributes {dimension_semantics = [#tpu.dimension_semantics<parallel>], iteration_bounds = array<i64: 1>, scalar_prefetch = 0 : i64, scratch_operands = 0 : i64, tpu.core_type = #tpu.core_type<tc>, window_params = [{transform_indices = @transform_0, window_bounds = array<i64: 2, 16, 128>}, {pipeline_mode = #tpu.pipeline_mode<synchronous>, transform_indices = @transform_1, window_bounds = array<i64: 128, 128>}, {pipeline_mode = #tpu.pipeline_mode<synchronous>, transform_indices = @transform_2, window_bounds = array<i64: 1, 128>}, {transform_indices = @transform_3, window_bounds = array<i64: 2, 128>}]} {
    %c0 = arith.constant 0 : index
    %c0_0 = arith.constant 0 : index
    %c0_1 = arith.constant 0 : index
    %0 = vector.load %arg1[%c0, %c0_0, %c0_1] : memref<2x16x128xf32, #tpu.memory_space<vmem>>, vector<2x16x128xf32>
    %cst = arith.constant dense<0.000000e+00> : vector<2x128xf32>
    %1 = vector.multi_reduction <add>, %0, %cst [1] : vector<2x16x128xf32> to vector<2x128xf32>
    %cst_2 = arith.constant 6.250000e-02 : f32
    %2 = vector.broadcast %cst_2 : f32 to vector<2x128xf32>
    %3 = arith.mulf %1, %2 : vector<2x128xf32>
    %4 = arith.truncf %3 : vector<2x128xf32> to vector<2x128xbf16>
    %c0_3 = arith.constant 0 : index
    %c0_4 = arith.constant 0 : index
    %5 = vector.load %arg2[%c0_3, %c0_4] : memref<128x128xbf16, #tpu.memory_space<vmem>>, vector<128x128xbf16>
    %cst_5 = arith.constant dense<0.000000e+00> : vector<2x128xf32>
    %6 = tpu.matmul %4, %5, %cst_5 {dimension_numbers = #tpu.dot_dimension_numbers<[1], [0], [0], [1], [0, 0, 1, 1], [], []>} : vector<2x128xbf16>, vector<128x128xbf16>, vector<2x128xf32> -> vector<2x128xf32>
    %c0_6 = arith.constant 0 : index
    %c0_7 = arith.constant 0 : index
    %7 = vector.load %arg3[%c0_6, %c0_7] : memref<1x128xf32, #tpu.memory_space<vmem>>, vector<1x128xf32>
    %8 = vector.broadcast %7 : vector<1x128xf32> to vector<2x128xf32>
    %9 = arith.addf %6, %8 : vector<2x128xf32>
    %c0_8 = arith.constant 0 : index
    %c0_9 = arith.constant 0 : index
    %10 = vector.load %arg4[%c0_8, %c0_9] : memref<2x128xf32, #tpu.memory_space<vmem>>, vector<2x128xf32>
    tpu.vector_store %arg4[%c0_8, %c0_9], %9 {strides = array<i32>} : memref<2x128xf32, #tpu.memory_space<vmem>>, vector<2x128xf32>,
    return
  }
  func.func @transform_0(%arg0: i32) -> (i32, i32, i32) {
    %c0_i32 = arith.constant 0 : i32
    %c0_i32_0 = arith.constant 0 : i32
    %c0_i32_1 = arith.constant 0 : i32
    return %arg0, %c0_i32, %c0_i32_0 : i32, i32, i32
  }
  func.func @transform_1(%arg0: i32) -> (i32, i32) {
    %c0_i32 = arith.constant 0 : i32
    %c0_i32_0 = arith.constant 0 : i32
    %c0_i32_1 = arith.constant 0 : i32
    return %c0_i32, %c0_i32_0 : i32, i32
  }
  func.func @transform_2(%arg0: i32) -> (i32, i32) {
    %c0_i32 = arith.constant 0 : i32
    %c0_i32_0 = arith.constant 0 : i32
    %c0_i32_1 = arith.constant 0 : i32
    return %c0_i32, %c0_i32_0 : i32, i32
  }
  func.func @transform_3(%arg0: i32) -> (i32, i32) {
    %c0_i32 = arith.constant 0 : i32
    %c0_i32_0 = arith.constant 0 : i32
    return %arg0, %c0_i32 : i32, i32
  }
}

</mosaic_0001>

<bundles_post_ra>
// kernel: _lambda_.4
= control target key start
LH: loop header
LB: loop body
LE: loop exit
PB: predicated region body
PF: predicated region fallthrough
CT: control target
= control target key end

     0   :  { %v184_v0 = vmov 0.0   ;;  %vm185_vm0 = vmmov 0   ;;  %s245_s1 = inlined_call_operand.vmem [shape: bf16[128,128], index: 1, kind: input, shape index: {}]   ;;  %s246_s0 = inlined_call_operand.vmem [shape: f32[16,128], index: 0, kind: input, shape index: {}]   ;;  %s247_s2 = inlined_call_operand.vmem [shape: f32[1,128], index: 2, kind: input, shape index: {}]   ;;  %s248_s3 = inlined_call_operand.vmem [shape: f32[16,128], index: 3, kind: output, shape index: {}]  }
   0x1   :  { %154 = vmatprep.subr.bf16.mxu0 %v184_v0  ;;  %v176_v1 = vld [vmem:[%s245_s1] sm:$0xff]   ;;  %170 = vmatprep.mubr.msk.bf16.mxu0 %vm185_vm0, %v184_v0  ;;  %v177_v2 = vld [vmem:[%s245_s1 + $0x8] sm:$0xff]   ;;  %v178_v3 = vld [vmem:[%s245_s1 + $0x10] sm:$0xff]  }
   0x2   :  { %155 = vmatpush3.bf16.msra.mxu0 %v176_v1  ;;  %v179_v4 = vld [vmem:[%s245_s1 + $0x18] sm:$0xff]   ;;  %v180_v5 = vld [vmem:[%s245_s1 + $0x20] sm:$0xff]   ;;  %v181_v6 = vld [vmem:[%s245_s1 + $0x28] sm:$0xff]  }
   0x3   :  { %156 = vmatprep.subr.bf16.mxu0 %v184_v0  ;;  %v182_v7 = vld [vmem:[%s245_s1 + $0x30] sm:$0xff]   ;;  %v183_v8 = vld [vmem:[%s245_s1 + $0x38] sm:$0xff]   ;;  %v15_v9 = vld [vmem:[%s246_s0] sm:$0xff] }
   0x4   :  { %v16_v10 = vld [vmem:[%s246_s0 + $0x8] sm:$0xff]  ;;  %v136_v12 = vld [vmem:[%s247_s2] ss:$0 sm:$0xff] }
   0x5   :  { %v17_v11 = vpack.c.bf16 %v16_v10, %v15_v9 }
   0x6   :  { %157 = vmatpush3.bf16.msra.mxu0 %v177_v2 }
   0x7   :  { %158 = vmatprep.subr.bf16.mxu0 %v184_v0 }
   0xa   :  { %159 = vmatpush3.bf16.msra.mxu0 %v178_v3 }
   0xb   :  { %160 = vmatprep.subr.bf16.mxu0 %v184_v0 }
   0xe   :  { %161 = vmatpush3.bf16.msra.mxu0 %v179_v4 }
   0xf   :  { %162 = vmatprep.subr.bf16.mxu0 %v184_v0 }
  0x12   :  { %163 = vmatpush3.bf16.msra.mxu0 %v180_v5 }
  0x13   :  { %164 = vmatprep.subr.bf16.mxu0 %v184_v0 }
  0x16   :  { %165 = vmatpush3.bf16.msra.mxu0 %v181_v6 }
  0x17   :  { %166 = vmatprep.subr.bf16.mxu0 %v184_v0 }
  0x1a   :  { %167 = vmatpush3.bf16.msra.mxu0 %v182_v7 }
  0x1b   :  { %168 = vmatprep.subr.bf16.mxu0 %v184_v0 }
  0x1e   :  { %169 = vmatpush3.bf16.msra.mxu0 %v183_v8 }
  0x21   :  { %171 = vmatmul.mubr.bf16.vlgmr.msra.gmra.mrb[0].mxu0 %v17_v11 }
  0xf4   :  { %v123_v13 = vpop.f32.mrb[0].mxu0 }
  0xf5   :  { %v124_v14 = vadd.f32 %v136_v12, %v123_v13  ;;  %v172_v15 = vpop.f32.mrb[1].mxu0 }
  0xf6   :  { %v126_v16 = vpop.f32.mrb[2].mxu0 }
  0xf7   :  { %130 = vst [vmem:[%s248_s3] sm:$0xff] %v124_v14  ;;  %v127_v17 = vadd.f32 %v136_v12, %v126_v16  ;;  %v173_v18 = vpop.f32.mrb[3].mxu0 }
  0xf9   :  { %131 = vst [vmem:[%s248_s3 + $0x8] sm:$0xff] %v127_v17 }

// kernel: _lambda_.5
= control target key start
LH: loop header
LB: loop body
LE: loop exit
PB: predicated region body
PF: predicated region fallthrough
CT: control target
= control target key end

     0   :  { %s480_s1 = inlined_call_operand.vmem [shape: bf16[128,128], index: 1, kind: input, shape index: {}]   ;;  %s481_s0 = inlined_call_operand.vmem [shape: f32[2,16,128], index: 0, kind: input, shape index: {}]   ;;  %s482_s3 = inlined_call_operand.vmem [shape: bf16[128,128], index: 3, kind: input, shape index: {}]   ;;  %s483_s2 = inlined_call_operand.vmem [shape: f32[1,128], index: 2, kind: input, shape index: {}]   ;;  %s484_s4 = inlined_call_operand.vmem [shape: f32[16,128], index: 4, kind: input, shape index: {}]   ;;  %s485_s5 = inlined_call_operand.vmem [shape: f32[2,16,128], index: 5, kind: output, shape index: {}]  }
   0x1   :  { %v353_v0 = vld [vmem:[%s480_s1] sm:$0xff]   ;;  %v354_v1 = vld [vmem:[%s480_s1 + $0x8] sm:$0xff]   ;;  %v355_v2 = vld [vmem:[%s480_s1 + $0x10] sm:$0xff]  }
   0x2   :  { %313 = vmatprep.subr.bf16.mxu0 %v353_v0  ;;  %v356_v3 = vld [vmem:[%s480_s1 + $0x18] sm:$0xff]   ;;  %v21_v4 = vld [vmem:[%s481_s0] sm:$0xff]  ;;  %v22_v5 = vld [vmem:[%s481_s0 + $0x8] sm:$0xff] }
   0x3   :  { %314 = vmatpush3.bf16.msra.mxu0 %v353_v0  ;;  %v25_v6 = vpack.c.bf16 %v22_v5, %v21_v4  ;;  %v361_v7 = vld [vmem:[%s482_s3] sm:$0xff]   ;;  %v362_v8 = vld [vmem:[%s482_s3 + $0x8] sm:$0xff]   ;;  %v363_v10 = vld [vmem:[%s482_s3 + $0x10] sm:$0xff]  }
   0x4   :  { %315 = vmatprep.subr.bf16.mxu0 %v354_v1  ;;  %v357_v9 = vld [vmem:[%s480_s1 + $0x20] sm:$0xff]   ;;  %333 = vmatprep.subr.bf16.mxu1 %v361_v7  ;;  %v358_v11 = vld [vmem:[%s480_s1 + $0x28] sm:$0xff]   ;;  %v364_v12 = vld [vmem:[%s482_s3 + $0x18] sm:$0xff]  }
   0x5   :  { %329 = vmatprep.mubr.bf16.mxu0 %v25_v6  ;;  %334 = vmatpush3.bf16.msra.mxu1 %v361_v7  ;;  %v359_v13 = vld [vmem:[%s480_s1 + $0x30] sm:$0xff]   ;;  %v365_v14 = vld [vmem:[%s482_s3 + $0x20] sm:$0xff]   ;;  %v360_v15 = vld [vmem:[%s480_s1 + $0x38] sm:$0xff]  }
   0x6   :  { %335 = vmatprep.subr.bf16.mxu1 %v362_v8  ;;  %v366_v16 = vld [vmem:[%s482_s3 + $0x28] sm:$0xff]   ;;  %v23_v17 = vld [vmem:[%s481_s0 + $0x10] sm:$0xff]  ;;  %v24_v18 = vld [vmem:[%s481_s0 + $0x18] sm:$0xff] }
   0x7   :  { %316 = vmatpush3.bf16.msra.mxu0 %v354_v1  ;;  %v26_v19 = vpack.c.bf16 %v24_v18, %v23_v17  ;;  %v367_v20 = vld [vmem:[%s482_s3 + $0x30] sm:$0xff]   ;;  %v368_v21 = vld [vmem:[%s482_s3 + $0x38] sm:$0xff]   ;;  %v276_v23 = vld [vmem:[%s483_s2] ss:$0 sm:$0xff] }
   0x8   :  { %317 = vmatprep.subr.bf16.mxu0 %v355_v2  ;;  %v262_v33 = vld [vmem:[%s484_s4] sm:$0xff]  ;;  %v263_v35 = vld [vmem:[%s484_s4 + $0x8] sm:$0xff] }
   0x9   :  { %336 = vmatpush3.bf16.msra.mxu1 %v362_v8 }
   0xa   :  { %337 = vmatprep.subr.bf16.mxu1 %v363_v10 }
   0xb   :  { %318 = vmatpush3.bf16.msra.mxu0 %v355_v2 }
   0xc   :  { %319 = vmatprep.subr.bf16.mxu0 %v356_v3 }
   0xd   :  { %338 = vmatpush3.bf16.msra.mxu1 %v363_v10 }
   0xe   :  { %339 = vmatprep.subr.bf16.mxu1 %v364_v12 }
   0xf   :  { %320 = vmatpush3.bf16.msra.mxu0 %v356_v3 }
  0x10   :  { %321 = vmatprep.subr.bf16.mxu0 %v357_v9 }
  0x11   :  { %340 = vmatpush3.bf16.msra.mxu1 %v364_v12 }
  0x12   :  { %341 = vmatprep.subr.bf16.mxu1 %v365_v14 }
  0x13   :  { %322 = vmatpush3.bf16.msra.mxu0 %v357_v9 }
  0x14   :  { %323 = vmatprep.subr.bf16.mxu0 %v358_v11 }
  0x15   :  { %342 = vmatpush3.bf16.msra.mxu1 %v365_v14 }
  0x16   :  { %343 = vmatprep.subr.bf16.mxu1 %v366_v16 }
  0x17   :  { %324 = vmatpush3.bf16.msra.mxu0 %v358_v11 }
  0x18   :  { %325 = vmatprep.subr.bf16.mxu0 %v359_v13 }
  0x19   :  { %344 = vmatpush3.bf16.msra.mxu1 %v366_v16 }
  0x1a   :  { %345 = vmatprep.subr.bf16.mxu1 %v367_v20 }
  0x1b   :  { %326 = vmatpush3.bf16.msra.mxu0 %v359_v13 }
  0x1c   :  { %327 = vmatprep.subr.bf16.mxu0 %v360_v15 }
  0x1d   :  { %346 = vmatpush3.bf16.msra.mxu1 %v367_v20 }
  0x1e   :  { %347 = vmatprep.subr.bf16.mxu1 %v368_v21 }
  0x1f   :  { %328 = vmatpush3.bf16.msra.mxu0 %v360_v15 }
  0x21   :  { %348 = vmatpush3.bf16.msra.mxu1 %v368_v21 }
  0x22   :  { %330 = vmatmul.mubr.bf16.vlgmr.msra.gmra.mrb[0].mxu0 %v26_v19 }
  0xf5   :  { %v331_v22 = vpop.f32.mrb[0].mxu0 }
  0xf6   :  { %v132_v24 = vpop.f32.mrb[1].mxu0  ;;  %v141_v26 = vadd.f32 %v331_v22, %v276_v23 }
  0xf7   :  { %v332_v25 = vpop.f32.mrb[2].mxu0  ;;  %v133_v29 = vadd.f32 %v276_v23, %v132_v24 }
  0xf8   :  { %v144_v27 = vadd.f32 %v332_v25, %v276_v23  ;;  %v135_v28 = vpop.f32.mrb[3].mxu0 }
  0xf9   :  { %v136_v30 = vadd.f32 %v276_v23, %v135_v28 }
  0xfa   :  { %v148_v31 = vpack.c.bf16 %v144_v27, %v141_v26 }
  0xfb   :  { %v147_v32 = vpack.c.bf16 %v136_v30, %v133_v29 }
  0xfd   :  { %349 = vmatprep.mubr.bf16.mxu1 %v147_v32 }
  0xfe   :  { %350 = vmatmul.mubr.bf16.vlgmr.msra.gmra.mrb[0].mxu1 %v148_v31 }
 0x1d1   :  { %v351_v34 = vpop.f32.mrb[0].mxu1 }
 0x1d2   :  { %v266_v36 = vadd.f32 %v351_v34, %v262_v33  ;;  %v247_v37 = vpop.f32.mrb[1].mxu1 }
 0x1d3   :  { %v264_v38 = vadd.f32 %v262_v33, %v247_v37  ;;  %v352_v39 = vpop.f32.mrb[2].mxu1 }
 0x1d4   :  { %270 = vst [vmem:[%s485_s5 + $0x10] sm:$0xff] %v266_v36  ;;  %v267_v40 = vadd.f32 %v352_v39, %v263_v35  ;;  %v250_v41 = vpop.f32.mrb[3].mxu1 }
 0x1d5   :  { %268 = vst [vmem:[%s485_s5] sm:$0xff] %v264_v38  ;;  %v265_v42 = vadd.f32 %v263_v35, %v250_v41 }
 0x1d6   :  { %271 = vst [vmem:[%s485_s5 + $0x18] sm:$0xff] %v267_v40 }
 0x1d7   :  { %269 = vst [vmem:[%s485_s5 + $0x8] sm:$0xff] %v265_v42 }

// kernel: _lambda_.7
= control target key start
LH: loop header
LB: loop body
LE: loop exit
PB: predicated region body
PF: predicated region fallthrough
CT: control target
= control target key end

     0   :  { %v245_v1 = vmov 0.0   ;;  %vm246_vm0 = vmmov 0   ;;  %s319_s0 = inlined_call_operand.vmem [shape: f32[2,16,128], index: 0, kind: input, shape index: {}]   ;;  %s320_s1 = inlined_call_operand.vmem [shape: bf16[128,128], index: 1, kind: input, shape index: {}]   ;;  %s321_s2 = inlined_call_operand.vmem [shape: f32[1,128], index: 2, kind: input, shape index: {}]   ;;  %s322_s3 = inlined_call_operand.hbm [shape: f32[2,128], index: 3, kind: output, shape index: {}]  }
   0x1   :  { %v213_v0 = vld [vmem:[%s320_s1] sm:$0xff]   ;;  %190 = vmatprep.subr.bf16.mxu0 %v245_v1  ;;  %v214_v2 = vld [vmem:[%s320_s1 + $0x8] sm:$0xff]   ;;  %206 = vmatprep.mubr.msk.bf16.mxu0 %vm246_vm0, %v245_v1  ;;  %v215_v3 = vld [vmem:[%s320_s1 + $0x10] sm:$0xff]  }
   0x2   :  { %191 = vmatpush3.bf16.msra.mxu0 %v213_v0  ;;  %v16_v4 = vld [vmem:[%s319_s0] sm:$0xff]  ;;  %v17_v5 = vld [vmem:[%s319_s0 + $0x8] sm:$0xff]  ;;  %v18_v6 = vld [vmem:[%s319_s0 + $0x10] sm:$0xff] }
   0x3   :  { %192 = vmatprep.subr.bf16.mxu0 %v245_v1  ;;  %v19_v7 = vld [vmem:[%s319_s0 + $0x18] sm:$0xff]  ;;  %v20_v8 = vadd.f32 %v17_v5, %v16_v4 }
   0x6   :  { %193 = vmatpush3.bf16.msra.mxu0 %v214_v2 }
   0x7   :  { %194 = vmatprep.subr.bf16.mxu0 %v245_v1 }
   0x8   :  { %8 = vsyncpa [#allocation3], 0  ;;  %v216_v9 = vld [vmem:[%s320_s1 + $0x18] sm:$0xff]   ;;  %v27_v10 = vadd.f32 %v19_v7, %v18_v6  ;;  %v21_v11 = vrot.slane %v20_v8, 4  ;;  %v217_v14 = vld [vmem:[%s320_s1 + $0x20] sm:$0xff]   ;;  %vm65_vm1 = vcmask 1041409  }
   0x9   :  { %v218_v19 = vld [vmem:[%s320_s1 + $0x28] sm:$0xff]   ;;  %v219_v24 = vld [vmem:[%s320_s1 + $0x30] sm:$0xff]   ;;  %v220_v29 = vld [vmem:[%s320_s1 + $0x38] sm:$0xff]   ;;  %s247_s10 = smov [#allocation2]  }
   0xa   :  { %195 = vmatpush3.bf16.msra.mxu0 %v215_v3  ;;  %v28_v12 = vrot.slane %v27_v10, 4  ;;  %v22_v13 = vadd.f32 %v21_v11, %v20_v8  ;;  %v172_v35 = vld [vmem:[%s321_s2] ss:$0 sm:$0xff]  ;;  %s164_s11 = sshll.u32 %s247_s10, 4  ;;  %s165_s11 = int_to_ptr.vmem [resolvable:$true] %s164_s11 }
   0xb   :  { %196 = vmatprep.subr.bf16.mxu0 %v245_v1  ;;  %s221_s1 = scalar_lea.vmem %s165_s11, 32  ;;  %p226_p1 = scmp.lt.s32.totalorder %s165_s11, %s165_s11 }
   0xc   :  { %v29_v15 = vadd.f32 %v28_v12, %v27_v10  ;;  %v23_v16 = vrot.slane %v22_v13, 2  ;;  %p222_p0 = scmp.ne.s32.totalorder %s165_s11, %s221_s1  ;;  %p227_p2 = scmp.lt.s32.totalorder %s221_s1, %s221_s1 }
   0xe   :  { %197 = vmatpush3.bf16.msra.mxu0 %v216_v9  ;;  %v30_v17 = vrot.slane %v29_v15, 2  ;;  %v24_v18 = vadd.f32 %v23_v16, %v22_v13  ;;  %p228_p3 = por %p227_p2, %p226_p1 }
   0xf   :  { %198 = vmatprep.subr.bf16.mxu0 %v245_v1 }
  0x10   :  { %v31_v20 = vadd.f32 %v30_v17, %v29_v15  ;;  %v25_v21 = vrot.slane %v24_v18, 1  ;;  %p229_p4 = pnand %p228_p3, %p222_p0 }
  0x12   :  { %199 = vmatpush3.bf16.msra.mxu0 %v217_v14  ;;  %v32_v22 = vrot.slane %v31_v20, 1  ;;  %v26_v23 = vadd.f32 %v25_v21, %v24_v18 }
  0x13   :  { %200 = vmatprep.subr.bf16.mxu0 %v245_v1 }
  0x14   :  { %v33_v25 = vadd.f32 %v32_v22, %v31_v20  ;;  %v34_v26 = vmul.f32 0.0625, %v26_v23 }
  0x16   :  { %201 = vmatpush3.bf16.msra.mxu0 %v218_v19  ;;  %v35_v27 = vmul.f32 0.0625, %v33_v25  ;;  %v36_v28 = vpack.c.bf16 %v34_v26, %v34_v26 }
  0x17   :  { %202 = vmatprep.subr.bf16.mxu0 %v245_v1 }
  0x18   :  { %v37_v30 = vpack.c.bf16 %v35_v27, %v35_v27  ;;  %v63_v31 = vunpack.c.l.b16 %v36_v28 }
  0x1a   :  { %203 = vmatpush3.bf16.msra.mxu0 %v219_v24  ;;  %v64_v32 = vunpack.c.l.b16 %v37_v30 }
  0x1b   :  { %204 = vmatprep.subr.bf16.mxu0 %v245_v1 }
  0x1c   :  { %v66_v33 = vsel %vm65_vm1, %v64_v32, %v63_v31 }
  0x1d   :  { %v67_v34 = vpack.c.b16 %v66_v33, %v66_v33 }
  0x1e   :  { %205 = vmatpush3.bf16.msra.mxu0 %v220_v29 }
  0x21   :  { %207 = vmatmul.mubr.bf16.vlgmr.msra.gmra.mrb[0].mxu0 %v67_v34 }
  0xf4   :  { %v151_v36 = vpop.f32.mrb[0].mxu0 }
  0xf5   :  { %v152_v37 = vadd.f32 %v172_v35, %v151_v36  ;;  %v208_v38 = vpop.f32.mrb[1].mxu0 }
  0xf6   :  { %v154_v39 = vpop.f32.mrb[2].mxu0 }
  0xf7   :  { %157 = vst [vmem:[#allocation2] sm:$0x3] %v152_v37  ;;  %v209_v40 = vpop.f32.mrb[3].mxu0 }
  0xf8   :  { %232 = shalt.err (!%p229_p4)
}
  0xf9   :  { %s233_s2 = scalar_lea.hbm %s322_s3, 32 }
  0xfa   :  { %p234_p5 = scmp.ne.s32.totalorder %s322_s3, %s233_s2  ;;  %p237_p6 = scmp.lt.u32.totalorder %s233_s2, %s322_s3 }
  0xfc   :  { %p239_p7 = pnand %p237_p6, %p234_p5 }
  0xfe   :  { %242 = shalt.err (!%p239_p7)
}
  0xff   :  { %167 = dma.vmem_to_hbm [thread:$0]  %s165_s11, 32, %s322_s3, [#allocation3]  }
 0x100   :  { %243 = dma.done.wait [#allocation3], 32  }
 0x101   :  { %244 = vsyncadd [#allocation3], 4294967264 }
 0x102   :  { %171 = vsyncpa [#allocation3], 1 }

// kernel: _lambda_.6
= control target key start
LH: loop header
LB: loop body
LE: loop exit
PB: predicated region body
PF: predicated region fallthrough
CT: control target
= control target key end

     0   :  { %s3360_s25 = smov 0   ;;  %s3362_s26 = smov 0   ;;  %s3812_s0 = inlined_call_operand.vmem [shape: f32[2,16,128], index: 0, kind: input, shape index: {}]   ;;  %s3813_s1 = inlined_call_operand.vmem [shape: bf16[2,128,384], index: 1, kind: input, shape index: {}]   ;;  %s3814_s2 = inlined_call_operand.vmem [shape: f32[2,1,384], index: 2, kind: input, shape index: {}]   ;;  %s3815_s3 = inlined_call_operand.vmem [shape: bf16[2,128,128], index: 3, kind: input, shape index: {}]   ;;  %s3816_s4 = inlined_call_operand.vmem [shape: f32[2,1,128], index: 4, kind: input, shape index: {}]   ;;  %s3817_s5 = inlined_call_operand.vmem [shape: f32[2,1,128], index: 5, kind: input, shape index: {}]   ;;  %s3818_s6 = inlined_call_operand.vmem [shape: f32[2,1,128], index: 6, kind: input, shape index: {}]   ;;  %s3819_s7 = inlined_call_operand.vmem [shape: bf16[2,128,128], index: 7, kind: input, shape index: {}]   ;;  %s3820_s8 = inlined_call_operand.vmem [shape: f32[2,1,128], index: 8, kind: input, shape index: {}]   ;;  %s3821_s9 = inlined_call_operand.vmem [shape: bf16[2,128,128], index: 9, kind: input, shape index: {}]   ;;  %s3822_s10 = inlined_call_operand.vmem [shape: f32[2,1,128], index: 10, kind: input, shape index: {}]   ;;  %s3823_s11 = inlined_call_operand.vmem [shape: f32[2,1,128], index: 11, kind: input, shape index: {}]   ;;  %s3824_s12 = inlined_call_operand.vmem [shape: f32[2,1,128], index: 12, kind: input, shape index: {}]   ;;  %s3825_s13 = inlined_call_operand.vmem [shape: f32[2,16,128], index: 13, kind: output, shape index: {}]  }
   0x1   :  { %3831 = sst [smem:[#allocation7_spill]] %s3812_s0  ;;  %s3364_s27 = smov 0  }
   0x2   :  { %3832 = sst [smem:[#allocation8_spill]] %s3813_s1 }
   0x3   :  { %3833 = sst [smem:[#allocation9_spill]] %s3815_s3 }
   0x4   :  { %3834 = sst [smem:[#allocation10_spill]] %s3825_s13 }
   0x5 LB: > { %3835 = sst [smem:[#allocation3_spill]] %s3278_s26  ;;  %s32_s28 = sadd.s32 1, %s3278_s26  ;;  %s3282_s27 = sphi %s3364_s27, %s23_s27   ;;  %s3278_s26 = sphi %s3362_s26, %s3851_s26   ;;  %s3274_s25 = sphi %s3360_s25, %s3850_s25  }
   0x6   : > { %3836 = sst [smem:[#allocation4_spill]] %s3282_s27  ;;  %p2721_p0 = scmp.ge.s32.totalorder %s3282_s27, 1 }
   0x7   : > { %p33_p1 = scmp.ge.s32.totalorder %s32_s28, 2  ;;  %p506_p2 = scmp.lt.s32.totalorder %s3282_s27, 3 }
   0x9   : > { %s3853_s28 = smov (%p33_p1, %s32_s28), 0  ;;  %p507_p3 = pnand %p2721_p0, %p506_p2 }
   0xa   : > { %3837 = sst [smem:[#allocation5_spill]] %s3853_s28 }
   0xb   : > { %510 = sbr.rel (%p507_p3) target bundleno = 4188 (0x105c), region = 72 }
  0x12   : > { %p604_p4 = scmp.lt.s32.totalorder %s3274_s25, 1  ;;  %s3838_s3 = sld [smem:[#allocation9_spill]] }
  0x13   : > { %s3840_s1 = sld [smem:[#allocation8_spill]]  ;;  %p2729_p5 = scmp.ne.s32.totalorder %s3274_s25, 0 }
  0x14   : > { %s3382_s29 = scalar_select %p604_p4, %s3274_s25, 1 }
  0x15   : > { %660 = sbr.rel (%p2729_p5) target bundleno = 32 (0x20), region = 76  ;;  %s3841_s26 = sld [smem:[#allocation7_spill]] (!%p2729_p5) }
  0x16   : > { %s3058_s30 = smul.u32 192, %s3382_s29  ;;  %s2807_s14 = sshll.u32 %s3382_s29, 6 }
  0x17   : > { %s3059_s15 = smul.u32 3, %s3382_s29  ;;  %s3417_s20 = scalar_lea.vmem %s3819_s7, %s2807_s14 }
  0x18   : > { %s3390_s18 = scalar_lea.vmem %s3838_s3, %s2807_s14  ;;  %s642_s16 = scalar_lea.vmem %s3822_s10, %s3382_s29 }
  0x19   : > { %3839 = sst [smem:[#allocation6_spill]] %s3390_s18  ;;  %s3395_s21 = scalar_lea.vmem %s3840_s1, %s3058_s30 }
  0x1a   : > { %s3404_s27 = scalar_lea.vmem %s3814_s2, %s3059_s15  ;;  %s3426_s15 = scalar_lea.vmem %s3821_s9, %s2807_s14 }
  0x1b   : > { %s645_s18 = scalar_lea.vmem %s3823_s11, %s3382_s29  ;;  %s648_s1 = scalar_lea.vmem %s3824_s12, %s3382_s29  ;;  %v661_v0 = vld [vmem:[%s3841_s26] sm:$0xff] (!%p2729_p5) }
  0x1c   : > { %s3842_s28 = smov %s3841_s26  ;;  %665 = vst [vmem:[#allocation2] sm:$0xff] %v661_v0 }
  0x1d   : > { %v662_v1 = vld [vmem:[%s3842_s28 + $0x8] sm:$0xff]  ;;  %v663_v2 = vld [vmem:[%s3842_s28 + $0x10] sm:$0xff]  ;;  %v664_v3 = vld [vmem:[%s3842_s28 + $0x18] sm:$0xff] }
  0x1e   : > { %666 = vst [vmem:[#allocation2 + $0x8] sm:$0xff] %v662_v1  ;;  %667 = vst [vmem:[#allocation2 + $0x10] sm:$0xff] %v663_v2 }
  0x1f   : > { %668 = vst [vmem:[#allocation2 + $0x18] sm:$0xff] %v664_v3 }
  0x20 PF: > { %v3120_v4 = vld [vmem:[%s3395_s21 + $0x4] ss:$12 sps:$4 sm:$0xff]   ;;  %v3122_v5 = vld [vmem:[%s3395_s21] ss:$12 sps:$4 sm:$0xff]   ;;  %v3284_v6 = vmov 0   ;;  %v3285_v27 = vmov 0.0   ;;  %v709_v28 = vlaneseq  ;;  %s3844_s23 = scalar_lea.vmem %s3816_s4, %s3382_s29  ;;  %s3845_s14 = scalar_lea.vmem %s3817_s5, %s3382_s29 }
  0x21   : > { %884 = vmatprep.mubr.bf16.mxu0 %v3284_v6  ;;  %852 = vmatprep.subr.bf16.mxu0 %v3120_v4  ;;  %v3123_v7 = vld [vmem:[%s3395_s21 + $0x1c] ss:$12 sps:$4 sm:$0xff]   ;;  %v3125_v8 = vld [vmem:[%s3395_s21 + $0x18] ss:$12 sps:$4 sm:$0xff]   ;;  %v3126_v9 = vld [vmem:[%s3395_s21 + $0x34] ss:$12 sps:$4 sm:$0xff]   ;;  %s3846_s3 = scalar_lea.vmem %s3818_s6, %s3382_s29 }
  0x22   : > { %853 = vmatpush1.bf16.msra.mxu0 %v3122_v5  ;;  %v3128_v10 = vld [vmem:[%s3395_s21 + $0x30] ss:$12 sps:$4 sm:$0xff]   ;;  %v3129_v11 = vld [vmem:[%s3395_s21 + $0x4c] ss:$12 sps:$4 sm:$0xff]   ;;  %v3131_v13 = vld [vmem:[%s3395_s21 + $0x48] ss:$12 sps:$4 sm:$0xff]  }
  0x23   : > { %854 = vmatprep.subr.bf16.mxu0 %v3123_v7  ;;  %v3132_v15 = vld [vmem:[%s3395_s21 + $0x64] ss:$12 sps:$4 sm:$0xff]   ;;  %v3134_v17 = vld [vmem:[%s3395_s21 + $0x60] ss:$12 sps:$4 sm:$0xff]   ;;  %v3135_v18 = vld [vmem:[%s3395_s21 + $0x7c] ss:$12 sps:$4 sm:$0xff]  }
  0x24   : > { %v3137_v19 = vld [vmem:[%s3395_s21 + $0x78] ss:$12 sps:$4 sm:$0xff]   ;;  %v3138_v20 = vld [vmem:[%s3395_s21 + $0x94] ss:$12 sps:$4 sm:$0xff]   ;;  %v3140_v21 = vld [vmem:[%s3395_s21 + $0x90] ss:$12 sps:$4 sm:$0xff]  }
  0x25   : > { %v670_v14 = vld [vmem:[#allocation2 + $0x8] sm:$0xff]  ;;  %v671_v24 = vld [vmem:[#allocation2 + $0x10] sm:$0xff]  ;;  %vm3286_vm0 = vmmov 0   ;;  %v3476_v29 = vshrl.u32 %v709_v28, 7  ;;  %v3480_v31 = vld [vmem:[%s3404_s27] sm:$0x7] }
  0x26   : > { %855 = vmatpush1.bf16.msra.mxu0 %v3125_v8  ;;  %v3141_v22 = vld [vmem:[%s3395_s21 + $0xac] ss:$12 sps:$4 sm:$0xff]   ;;  %v3143_v23 = vld [vmem:[%s3395_s21 + $0xa8] ss:$12 sps:$4 sm:$0xff]   ;;  %vm964_vm1 = vcmask 261120   ;;  %vm1059_vm2 = vcmask 130048  }
  0x27   : > { %856 = vmatprep.subr.bf16.mxu0 %v3126_v9  ;;  %v669_v12 = vld [vmem:[#allocation2] sm:$0xff]  ;;  %v672_v25 = vld [vmem:[#allocation2 + $0x18] sm:$0xff]  ;;  %v711_v30 = vsub.s32 0, %v3476_v29  ;;  %v715_v32 = vsub.s32 1, %v3476_v29  ;;  %v3144_v61 = vld [vmem:[%s3395_s21 + $0x8] ss:$12 sps:$4 sm:$0xff]  }
  0x28   : > { %v673_v16 = vpack.c.bf16 %v670_v14, %v669_v12  ;;  %v3469_v26 = vpack.c.bf16 %v672_v25, %v671_v24  ;;  %v3145_v62 = vld [vmem:[%s3395_s21 + $0x20] ss:$12 sps:$4 sm:$0xff]   ;;  %2882 = vmatprep.subr.bf16.mxu1 %v3144_v61  ;;  %v3146_v63 = vld [vmem:[%s3395_s21 + $0x38] ss:$12 sps:$4 sm:$0xff]   ;;  %v3147_v0 = vld [vmem:[%s3395_s21 + $0x50] ss:$12 sps:$4 sm:$0xff]  }
  0x29   : > { %v712_v33 = vrot.slane %v3480_v31, %v711_v30  ;;  %v716_v35 = vrot.slane %v3480_v31, %v715_v32  ;;  %2883 = vmatpush3.bf16.msra.mxu1 %v3144_v61  ;;  %v3148_v1 = vld [vmem:[%s3395_s21 + $0x68] ss:$12 sps:$4 sm:$0xff]   ;;  %v3149_v2 = vld [vmem:[%s3395_s21 + $0x80] ss:$12 sps:$4 sm:$0xff]   ;;  %v3150_v3 = vld [vmem:[%s3395_s21 + $0x98] ss:$12 sps:$4 sm:$0xff]  }
  0x2a   : > { %857 = vmatpush1.bf16.msra.mxu0 %v3128_v10  ;;  %2898 = vmatprep.mubr.bf16.mxu1 %v673_v16  ;;  %v3151_v4 = vld [vmem:[%s3395_s21 + $0xb0] ss:$12 sps:$4 sm:$0xff]   ;;  %s3287_s27 = smov 96   ;;  %s3288_s21 = smov 64   ;;  %vm1978_vm3 = vcmask 523264   ;;  %vm1983_vm4 = vcmask 785408  }
  0x2b   : > { %858 = vmatprep.subr.bf16.mxu0 %v3129_v11  ;;  %2884 = vmatprep.subr.bf16.mxu1 %v3145_v62  ;;  %s3289_s24 = smov 32   ;;  %s3843_s19 = sld [smem:[#allocation6_spill]] }
  0x2c   : > { %p2802_p6 = scmp.ne.s32.totalorder %s3274_s25, 1 }
  0x2d   : > { %2885 = vmatpush3.bf16.msra.mxu1 %v3145_v62 }
  0x2e   : > { %859 = vmatpush1.bf16.msra.mxu0 %v3131_v13  ;;  %2886 = vmatprep.subr.bf16.mxu1 %v3146_v63 }
  0x2f   : > { %860 = vmatprep.subr.bf16.mxu0 %v3132_v15 }
  0x31   : > { %2887 = vmatpush3.bf16.msra.mxu1 %v3146_v63 }
  0x32   : > { %861 = vmatpush1.bf16.msra.mxu0 %v3134_v17  ;;  %2888 = vmatprep.subr.bf16.mxu1 %v3147_v0 }
  0x33   : > { %862 = vmatprep.subr.bf16.mxu0 %v3135_v18 }
  0x35   : > { %2889 = vmatpush3.bf16.msra.mxu1 %v3147_v0 }
  0x36   : > { %863 = vmatpush1.bf16.msra.mxu0 %v3137_v19  ;;  %2890 = vmatprep.subr.bf16.mxu1 %v3148_v1 }
  0x37   : > { %864 = vmatprep.subr.bf16.mxu0 %v3138_v20 }
  0x39   : > { %2891 = vmatpush3.bf16.msra.mxu1 %v3148_v1 }
  0x3a   : > { %865 = vmatpush1.bf16.msra.mxu0 %v3140_v21  ;;  %2892 = vmatprep.subr.bf16.mxu1 %v3149_v2 }
  0x3b   : > { %866 = vmatprep.subr.bf16.mxu0 %v3141_v22 }
  0x3d   : > { %2893 = vmatpush3.bf16.msra.mxu1 %v3149_v2 }
  0x3e   : > { %867 = vmatpush1.bf16.msra.mxu0 %v3143_v23  ;;  %2894 = vmatprep.subr.bf16.mxu1 %v3150_v3 }
  0x3f   : > { %2902 = vmatprep.subr.bf16.mxu0 %v3285_v27 }
  0x41   : > { %885 = vmatmul.mubr.bf16.vlgmr.msra.gmra.mrb[0].mxu0 %v673_v16  ;;  %2895 = vmatpush3.bf16.msra.mxu1 %v3150_v3 }
  0x42   : > { %894 = vmatprep.mubr.bf16.mxu0 %v3284_v6  ;;  %2896 = vmatprep.subr.bf16.mxu1 %v3151_v4 }
  0x45   : > { %2897 = vmatpush3.bf16.msra.mxu1 %v3151_v4 }
  0x46   : > { %2914 = vmatprep.subr.bf16.mxu1 %v3285_v27 }
  0x48   : > { %2899 = vmatmul.mubr.bf16.vlgmr.msra.gmra.mrb[0].mxu1 %v3469_v26 }
  0x49   : > { %895 = vmatmul.mubr.bf16.gmra.mrb[4].mxu0 %v3469_v26  ;;  %2916 = vmatprep.mubr.msk.bf16.mxu1 %vm3286_vm0, %v3285_v27 }
  0x4a   : > { %2904 = vmatprep.mubr.msk.bf16.mxu0 %vm3286_vm0, %v3285_v27 }
 0x114   : > { %v886_v34 = vpop.f32.mrb[0].mxu0 }
 0x115   : > { %v887_v36 = vadd.f32 %v886_v34, %v712_v33  ;;  %v888_v37 = vpop.f32.mrb[1].mxu0 }
 0x116   : > { %v890_v38 = vpop.f32.mrb[2].mxu0  ;;  %v889_v41 = vadd.f32 %v888_v37, %v716_v35 }
 0x117   : > { %v891_v39 = vadd.f32 %v890_v38, %v712_v33  ;;  %v892_v40 = vpop.f32.mrb[3].mxu0  ;;  %v954_v43 = vmul.f32 0.35355338, %v887_v36  ;;  %v719_v36 = vsub.s32 2, %v3476_v29 }
 0x118   : > { %v893_v42 = vadd.f32 %v892_v40, %v716_v35 }
 0x119   : > { %v955_v44 = vmul.f32 0.35355338, %v891_v39  ;;  %v720_v39 = vrot.slane %v3480_v31, %v719_v36 }
 0x11a   : > { %v3485_v45 = vpack.c.bf16 %v893_v42, %v889_v41 }
 0x11b   : > { %v3487_v46 = vpack.c.bf16 %v955_v44, %v954_v43  ;;  %v2900_v37 = vpop.f32.mrb[0].mxu1 }
 0x11c   : > { %v896_v47 = vpop.f32.mrb[4].mxu0  ;;  %v969_v48 = vsel %vm964_vm1, %v3485_v45, 0  ;;  %v939_v38 = vpop.f32.mrb[1].mxu1 }
 0x11d   : > { %v897_v49 = vadd.f32 %v896_v47, %v712_v33  ;;  %v898_v50 = vpop.f32.mrb[5].mxu0  ;;  %2903 = vmatpush3.bf16.xpose.msra.mxu0 %v969_v48  ;;  %v2901_v40 = vpop.f32.mrb[2].mxu1  ;;  %v940_v42 = vadd.f32 %v939_v38, %v720_v39  ;;  %v948_v47 = vadd.f32 %v2900_v37, %v720_v39 }
 0x11e   : > { %v899_v51 = vadd.f32 %v898_v50, %v716_v35  ;;  %v900_v52 = vpop.f32.mrb[6].mxu0  ;;  %2908 = vmatprep.subr.bf16.mxu0 %v3285_v27  ;;  %v942_v41 = vpop.f32.mrb[3].mxu1  ;;  %v951_v29 = vadd.f32 %v2901_v40, %v720_v39 }
 0x11f   : > { %v956_v53 = vmul.f32 0.35355338, %v897_v49  ;;  %v901_v54 = vadd.f32 %v900_v52, %v712_v33  ;;  %v902_v55 = vpop.f32.mrb[7].mxu0  ;;  %v943_v43 = vadd.f32 %v942_v41, %v720_v39 }
 0x120   : > { %v903_v56 = vadd.f32 %v902_v55, %v716_v35  ;;  %v3536_v31 = vpack.c.bf16 %v951_v29, %v948_v47 }
 0x121   : > { %v957_v57 = vmul.f32 0.35355338, %v901_v54  ;;  %v3530_v44 = vpack.c.bf16 %v943_v43, %v940_v42 }
 0x122   : > { %v3492_v58 = vpack.c.bf16 %v903_v56, %v899_v51 }
 0x123   : > { %v3494_v59 = vpack.c.bf16 %v957_v57, %v956_v53  ;;  %2915 = vmatpush3.bf16.msra.mxu1 %v3530_v44 }
 0x124   : > { %2905 = vmatmul.mubr.msk.bf16.vlgmr.msra.gmra.mrb[8].mxu0 %vm964_vm1, %v3487_v46  ;;  %v1016_v60 = vsel %vm964_vm1, %v3492_v58, 0  ;;  %2926 = vmatprep.subr.bf16.mxu1 %v3285_v27 }
 0x125   : > { %2909 = vmatpush3.bf16.xpose.msra.mxu0 %v1016_v60  ;;  %2910 = vmatprep.mubr.msk.bf16.mxu0 %vm3286_vm0, %v3285_v27 }
 0x126   : > { %2920 = vmatprep.subr.bf16.mxu0 %v3285_v27 }
 0x12c   : > { %2911 = vmatmul.mubr.msk.bf16.vlgmr.msra.gmra.mrb[12].mxu0 %vm964_vm1, %v3494_v59 }
 0x12d   : > { %2922 = vmatprep.mubr.msk.bf16.mxu0 %vm3286_vm0, %v3285_v27  ;;  %2921 = vmatpush3.bf16.msra.mxu0 %v3536_v31 }
 0x12e   : > { %2932 = vmatprep.subr.bf16.mxu0 %v3285_v27 }
 0x1f7   : > { %v1005_v5 = vpop.f32.mrb[8].mxu0 }
 0x1f8   : > { %v2906_v6 = vpop.f32.mrb[9].mxu0  ;;  %v1060_v7 = vsel %vm1059_vm2, %v1005_v5, -inf }
 0x1f9   : > { %1061 = vmax.xlane.f32.xlu0 %v1060_v7  ;;  %v1008_v8 = vpop.f32.mrb[10].mxu0 }
 0x1fa   : > { %v2907_v9 = vpop.f32.mrb[11].mxu0  ;;  %v1063_v10 = vsel %vm1059_vm2, %v1008_v8, -inf }
 0x1fd   : > { %1064 = vmax.xlane.f32.xlu0 %v1063_v10 }
 0x1ff   : > { %v1052_v11 = vpop.f32.mrb[12].mxu0 }
 0x200   : > { %v1066_v12 = vsel %vm1059_vm2, %v1052_v11, -inf  ;;  %v2912_v13 = vpop.f32.mrb[13].mxu0 }
 0x201   : > { %1067 = vmax.xlane.f32.xlu1 %v1066_v12  ;;  %v1055_v14 = vpop.f32.mrb[14].mxu0 }
 0x202   : > { %v1069_v15 = vsel %vm1059_vm2, %v1055_v14, -inf  ;;  %v2913_v16 = vpop.f32.mrb[15].mxu0 }
 0x205   : > { %1070 = vmax.xlane.f32.xlu1 %v1069_v15 }
 0x286   : > { %v1062_v17 = vpop.xlane.xlu0 %1061 }
 0x287   : > { %v1072_v18 = vsub.f32 %v1005_v5, %v1062_v17 }
 0x289   : > { %v1076_v19 = vmul.f32 1.442695, %v1072_v18 }
 0x28a   : > { %v1065_v20 = vpop.xlane.xlu0 %1064 }
 0x28b   : > { %3176 = vpow2.f32 %v1076_v19  ;;  %v1073_v21 = vsub.f32 %v1008_v8, %v1065_v20 }
 0x28d   : > { %v1078_v22 = vmul.f32 1.442695, %v1073_v21 }
 0x28e   : > { %v1068_v23 = vpop.xlane.xlu1 %1067 }
 0x28f   : > { %3178 = vpow2.f32 %v1078_v22  ;;  %v1074_v24 = vsub.f32 %v1052_v11, %v1068_v23 }
 0x291   : > { %v1080_v25 = vmul.f32 1.442695, %v1074_v24 }
 0x292   : > { %v1071_v48 = vpop.xlane.xlu1 %1070 }
 0x293   : > { %3180 = vpow2.f32 %v1080_v25  ;;  %v1075_v49 = vsub.f32 %v1055_v14, %v1071_v48 }
 0x295   : > { %v3177_v26 = vpop.eup %3176  ;;  %v1082_v50 = vmul.f32 1.442695, %v1075_v49 }
 0x296   : > { %v1084_v30 = vsel %vm1059_vm2, %v3177_v26, 0.0 }
 0x297   : > { %1085 = vadd.xlane.f32.xlu0 %v1084_v30  ;;  %3182 = vpow2.f32 %v1082_v50 }
 0x299   : > { %v3179_v32 = vpop.eup %3178 }
 0x29a   : > { %v1087_v33 = vsel %vm1059_vm2, %v3179_v32, 0.0 }
 0x29b   : > { %1088 = vadd.xlane.f32.xlu1 %v1087_v33 }
 0x29d   : > { %v3181_v34 = vpop.eup %3180 }
 0x29e   : > { %v1090_v35 = vsel %vm1059_vm2, %v3181_v34, 0.0 }
 0x29f   : > { %1091 = vadd.xlane.f32.xlu0 %v1090_v35 }
 0x2a1   : > { %v3183_v51 = vpop.eup %3182 }
 0x2a2   : > { %v1093_v52 = vsel %vm1059_vm2, %v3183_v51, 0.0 }
 0x2ac   : > { %1251 = vrot.lane.b32.xlu1 %v3492_v58, %s3287_s27 }
 0x2b5   : > { %1198 = vrot.lane.b32.xlu0 %v3485_v45, %s3287_s27 }
 0x2d0   : > { %1094 = vadd.xlane.f32.xlu1 %v1093_v52 }
 0x2e1   : > { %1195 = vrot.lane.b32.xlu1 %v3487_v46, %s3287_s27 }
 0x2e5   : > { %1248 = vrot.lane.b32.xlu1 %v3494_v59, %s3287_s27 }
 0x324   : > { %v1086_v53 = vpop.xlane.xlu0 %1085 }
 0x325   : > { %3184 = vrcp.f32 %v1086_v53 }
 0x328   : > { %v1089_v54 = vpop.xlane.xlu1 %1088 }
 0x329   : > { %3186 = vrcp.f32 %v1089_v54 }
 0x32c   : > { %v1092_v55 = vpop.xlane.xlu0 %1091  ;;  %v1252_v1 = vpop.permute.xlu1 %1251 }
 0x32d   : > { %3188 = vrcp.f32 %v1092_v55  ;;  %v1257_v9 = vsel %vm964_vm1, %v1252_v1, 0 }
 0x32f   : > { %v3185_v56 = vpop.eup %3184 }
 0x330   : > { %v1100_v60 = vmul.f32 %v3185_v56, %v3177_v26  ;;  %v1199_v62 = vpop.permute.xlu0 %1198 }
 0x331   : > { %v1204_v0 = vsel %vm964_vm1, %v1199_v62, 0 }
 0x333   : > { %v3187_v57 = vpop.eup %3186 }
 0x334   : > { %v1101_v61 = vmul.f32 %v3187_v57, %v3179_v32 }
 0x336   : > { %v1104_v63 = vpack.c.bf16 %v1101_v61, %v1100_v60 }
 0x337   : > { %v3189_v4 = vpop.eup %3188 }
 0x338   : > { %2917 = vmatmul.mubr.msk.bf16.vlgmr.msra.gmra.mrb[4].mxu1 %vm1059_vm2, %v1104_v63  ;;  %v1102_v6 = vmul.f32 %v3189_v4, %v3181_v34 }
 0x339   : > { %2927 = vmatpush3.bf16.xpose.msra.mxu1 %v1204_v0  ;;  %2928 = vmatprep.mubr.msk.bf16.mxu1 %vm3286_vm0, %v3285_v27 }
 0x33a   : > { %2938 = vmatprep.subr.bf16.mxu1 %v3285_v27 }
 0x35d   : > { %v1095_v2 = vpop.xlane.xlu1 %1094 }
 0x35e   : > { %3190 = vrcp.f32 %v1095_v2 }
 0x361   : > { %v1196_v3 = vpop.permute.xlu1 %1195 }
 0x362   : > { %2929 = vmatmul.mubr.msk.bf16.vlgmr.msra.gmra.mrb[8].mxu1 %vm964_vm1, %v1196_v3 }
 0x363   : > { %2940 = vmatprep.mubr.msk.bf16.mxu1 %vm3286_vm0, %v3285_v27 }
 0x365   : > { %v1249_v10 = vpop.permute.xlu1 %1248 }
 0x368   : > { %v3191_v5 = vpop.eup %3190 }
 0x369   : > { %v1103_v7 = vmul.f32 %v3191_v5, %v3183_v51 }
 0x36b   : > { %v1105_v8 = vpack.c.bf16 %v1103_v7, %v1102_v6 }
 0x36d   : > { %2923 = vmatmul.mubr.msk.bf16.vlgmr.msra.gmra.mrb[16].mxu0 %vm1059_vm2, %v1105_v8 }
 0x36e   : > { %2933 = vmatpush3.bf16.xpose.msra.mxu0 %v1257_v9  ;;  %2934 = vmatprep.mubr.msk.bf16.mxu0 %vm3286_vm0, %v3285_v27 }
 0x36f   : > { %2944 = vmatprep.subr.bf16.mxu0 %v3285_v27 }
 0x375   : > { %2935 = vmatmul.mubr.msk.bf16.vlgmr.msra.gmra.mrb[20].mxu0 %vm964_vm1, %v1249_v10 }
 0x376   : > { %2946 = vmatprep.mubr.msk.bf16.mxu0 %vm3286_vm0, %v3285_v27 }
 0x40b   : > { %v3561_v11 = vpop.f32.mrb[4].mxu1 }
 0x40c   : > { %v2918_v12 = vpop.f32.mrb[5].mxu1 }
 0x40d   : > { %v3563_v13 = vpop.f32.mrb[6].mxu1 }
 0x40e   : > { %v2919_v14 = vpop.f32.mrb[7].mxu1 }
 0x435   : > { %v1240_v15 = vpop.f32.mrb[8].mxu1 }
 0x436   : > { %v2930_v16 = vpop.f32.mrb[9].mxu1  ;;  %v1300_v17 = vsel %vm1059_vm2, %v1240_v15, -inf }
 0x437   : > { %1301 = vmax.xlane.f32.xlu0 %v1300_v17  ;;  %v1243_v18 = vpop.f32.mrb[10].mxu1 }
 0x438   : > { %v2931_v19 = vpop.f32.mrb[11].mxu1  ;;  %v1303_v20 = vsel %vm1059_vm2, %v1243_v18, -inf }
 0x439   : > { %1304 = vmax.xlane.f32.xlu1 %v1303_v20 }
 0x440   : > { %v3567_v21 = vpop.f32.mrb[16].mxu0 }
 0x441   : > { %v2924_v22 = vpop.f32.mrb[17].mxu0 }
 0x442   : > { %v3569_v23 = vpop.f32.mrb[18].mxu0 }
 0x443   : > { %v2925_v24 = vpop.f32.mrb[19].mxu0 }
 0x448   : > { %v1293_v25 = vpop.f32.mrb[20].mxu0 }
 0x449   : > { %v2936_v26 = vpop.f32.mrb[21].mxu0  ;;  %v1306_v30 = vsel %vm1059_vm2, %v1293_v25, -inf }
 0x44a   : > { %1307 = vmax.xlane.f32.xlu0 %v1306_v30  ;;  %v1296_v32 = vpop.f32.mrb[22].mxu0 }
 0x44b   : > { %v2937_v33 = vpop.f32.mrb[23].mxu0  ;;  %v1309_v34 = vsel %vm1059_vm2, %v1296_v32, -inf }
 0x44e   : > { %1310 = vmax.xlane.f32.xlu0 %v1309_v34 }
 0x4c4   : > { %v1302_v35 = vpop.xlane.xlu0 %1301 }
 0x4c5   : > { %v1312_v36 = vsub.f32 %v1240_v15, %v1302_v35 }
 0x4c6   : > { %v1305_v37 = vpop.xlane.xlu1 %1304 }
 0x4c7   : > { %v1316_v38 = vmul.f32 1.442695, %v1312_v36  ;;  %v1313_v39 = vsub.f32 %v1243_v18, %v1305_v37 }
 0x4c9   : > { %3192 = vpow2.f32 %v1316_v38  ;;  %v1318_v40 = vmul.f32 1.442695, %v1313_v39 }
 0x4cb   : > { %3194 = vpow2.f32 %v1318_v40 }
 0x4d3   : > { %v3193_v41 = vpop.eup %3192 }
 0x4d4   : > { %v1324_v42 = vsel %vm1059_vm2, %v3193_v41, 0.0 }
 0x4d5   : > { %v3195_v43 = vpop.eup %3194  ;;  %1325 = vadd.xlane.f32.xlu0 %v1324_v42 }
 0x4d6   : > { %v1327_v47 = vsel %vm1059_vm2, %v3195_v43, 0.0 }
 0x4d7   : > { %1328 = vadd.xlane.f32.xlu1 %v1327_v47  ;;  %v1308_v29 = vpop.xlane.xlu0 %1307 }
 0x4d8   : > { %v1314_v48 = vsub.f32 %v1293_v25, %v1308_v29 }
 0x4da   : > { %v1320_v49 = vmul.f32 1.442695, %v1314_v48 }
 0x4db   : > { %v1311_v52 = vpop.xlane.xlu0 %1310 }
 0x4dc   : > { %3196 = vpow2.f32 %v1320_v49  ;;  %v1315_v53 = vsub.f32 %v1296_v32, %v1311_v52 }
 0x4de   : > { %v1322_v54 = vmul.f32 1.442695, %v1315_v53 }
 0x4e0   : > { %3198 = vpow2.f32 %v1322_v54 }
 0x4e6   : > { %v3197_v50 = vpop.eup %3196 }
 0x4e7   : > { %v1330_v51 = vsel %vm1059_vm2, %v3197_v50, 0.0 }
 0x4e8   : > { %1395 = vrot.lane.b32.xlu1 %v3536_v31, %s3287_s27  ;;  %1331 = vadd.xlane.f32.xlu0 %v1330_v51 }
 0x4ea   : > { %v3199_v55 = vpop.eup %3198 }
 0x4eb   : > { %v1333_v56 = vsel %vm1059_vm2, %v3199_v55, 0.0 }
 0x4ec   : > { %1444 = vrot.lane.b32.xlu1 %v3485_v45, %s3288_s21 }
 0x4fe   : > { %1347 = vrot.lane.b32.xlu0 %v3530_v44, %s3287_s27 }
 0x502   : > { %1442 = vrot.lane.b32.xlu0 %v3487_v46, %s3288_s21 }
 0x510   : > { %1334 = vadd.xlane.f32.xlu1 %v1333_v56 }
 0x521   : > { %1495 = vrot.lane.b32.xlu1 %v3492_v58, %s3288_s21 }
 0x525   : > { %1493 = vrot.lane.b32.xlu1 %v3494_v59, %s3288_s21 }
 0x562   : > { %v1326_v61 = vpop.xlane.xlu0 %1325 }
 0x564   : > { %v1329_v57 = vpop.xlane.xlu1 %1328 }
 0x565   : > { %3200 = vrcp.f32 %v1329_v57 }
 0x566   : > { %3202 = vrcp.f32 %v1326_v61 }
 0x568   : > { %v1396_v60 = vpop.permute.xlu1 %1395 }
 0x569   : > { %2945 = vmatpush3.bf16.msra.mxu0 %v1396_v60 }
 0x56a   : > { %2956 = vmatprep.subr.bf16.mxu0 %v3285_v27 }
 0x56c   : > { %v1445_v5 = vpop.permute.xlu1 %1444 }
 0x56d   : > { %v1450_v6 = vsel %vm964_vm1, %v1445_v5, 0 }
 0x56f   : > { %v3201_v62 = vpop.eup %3200 }
 0x570   : > { %v3203_v0 = vpop.eup %3202  ;;  %v1341_v1 = vmul.f32 %v3201_v62, %v3195_v43 }
 0x571   : > { %v1340_v2 = vmul.f32 %v3203_v0, %v3193_v41 }
 0x573   : > { %v1344_v4 = vpack.c.bf16 %v1341_v1, %v1340_v2 }
 0x575   : > { %v1332_v63 = vpop.xlane.xlu0 %1331 }
 0x576   : > { %3204 = vrcp.f32 %v1332_v63 }
 0x579   : > { %v1348_v3 = vpop.permute.xlu0 %1347 }
 0x57a   : > { %2939 = vmatpush3.bf16.msra.mxu1 %v1348_v3 }
 0x57b   : > { %2950 = vmatprep.subr.bf16.mxu1 %v3285_v27 }
 0x57d   : > { %2941 = vmatmul.mubr.msk.bf16.vlgmr.msra.gmra.mrb[12].mxu1 %vm1059_vm2, %v1344_v4  ;;  %v1443_v7 = vpop.permute.xlu0 %1442 }
 0x57e   : > { %2952 = vmatprep.mubr.msk.bf16.mxu1 %vm3286_vm0, %v3285_v27 }
 0x580   : > { %v3205_v9 = vpop.eup %3204 }
 0x581   : > { %v1342_v12 = vmul.f32 %v3205_v9, %v3197_v50 }
 0x583   : > { %2951 = vmatpush3.bf16.xpose.msra.mxu1 %v1450_v6 }
 0x584   : > { %2962 = vmatprep.subr.bf16.mxu1 %v3285_v27 }
 0x58a   : > { %2953 = vmatmul.mubr.msk.bf16.vlgmr.msra.gmra.mrb[16].mxu1 %vm964_vm1, %v1443_v7 }
 0x58b   : > { %2964 = vmatprep.mubr.msk.bf16.mxu1 %vm3286_vm0, %v3285_v27 }
 0x59d   : > { %v1335_v8 = vpop.xlane.xlu1 %1334 }
 0x59e   : > { %3206 = vrcp.f32 %v1335_v8 }
 0x5a1   : > { %v1496_v15 = vpop.permute.xlu1 %1495 }
 0x5a2   : > { %v1501_v17 = vsel %vm964_vm1, %v1496_v15, 0 }
 0x5a5   : > { %v1494_v18 = vpop.permute.xlu1 %1493 }
 0x5a8   : > { %v3207_v10 = vpop.eup %3206 }
 0x5a9   : > { %v1343_v14 = vmul.f32 %v3207_v10, %v3199_v55 }
 0x5ab   : > { %v1345_v16 = vpack.c.bf16 %v1343_v14, %v1342_v12 }
 0x5ad   : > { %2947 = vmatmul.mubr.msk.bf16.vlgmr.msra.gmra.mrb[24].mxu0 %vm1059_vm2, %v1345_v16 }
 0x5ae   : > { %2957 = vmatpush3.bf16.xpose.msra.mxu0 %v1501_v17  ;;  %2958 = vmatprep.mubr.msk.bf16.mxu0 %vm3286_vm0, %v3285_v27 }
 0x5af   : > { %2968 = vmatprep.subr.bf16.mxu0 %v3285_v27 }
 0x5b5   : > { %2959 = vmatmul.mubr.msk.bf16.vlgmr.msra.gmra.mrb[28].mxu0 %vm964_vm1, %v1494_v18 }
 0x5b6   : > { %2970 = vmatprep.mubr.msk.bf16.mxu0 %vm3286_vm0, %v3285_v27 }
 0x650   : > { %v3607_v19 = vpop.f32.mrb[12].mxu1 }
 0x651   : > { %v2942_v20 = vpop.f32.mrb[13].mxu1 }
 0x652   : > { %v3609_v22 = vpop.f32.mrb[14].mxu1 }
 0x653   : > { %v3090_v24 = vpack.i.bf16 %v3609_v22, %v3607_v19  ;;  %v2943_v25 = vpop.f32.mrb[15].mxu1 }
 0x65d   : > { %v1486_v26 = vpop.f32.mrb[16].mxu1 }
 0x65e   : > { %v2954_v30 = vpop.f32.mrb[17].mxu1  ;;  %v1544_v32 = vsel %vm1059_vm2, %v1486_v26, -inf }
 0x65f   : > { %1545 = vmax.xlane.f32.xlu0 %v1544_v32  ;;  %v1489_v33 = vpop.f32.mrb[18].mxu1 }
 0x660   : > { %v2955_v34 = vpop.f32.mrb[19].mxu1  ;;  %v1547_v35 = vsel %vm1059_vm2, %v1489_v33, -inf }
 0x661   : > { %1548 = vmax.xlane.f32.xlu1 %v1547_v35 }
 0x680   : > { %v3615_v36 = vpop.f32.mrb[24].mxu0 }
 0x681   : > { %v2948_v37 = vpop.f32.mrb[25].mxu0 }
 0x682   : > { %v3617_v38 = vpop.f32.mrb[26].mxu0 }
 0x683   : > { %v3095_v39 = vpack.i.bf16 %v3617_v38, %v3615_v36  ;;  %v2949_v40 = vpop.f32.mrb[27].mxu0 }
 0x688   : > { %v1537_v41 = vpop.f32.mrb[28].mxu0 }
 0x689   : > { %v2960_v42 = vpop.f32.mrb[29].mxu0  ;;  %v1550_v43 = vsel %vm1059_vm2, %v1537_v41, -inf }
 0x68a   : > { %1551 = vmax.xlane.f32.xlu0 %v1550_v43  ;;  %v1540_v47 = vpop.f32.mrb[30].mxu0 }
 0x68b   : > { %v2961_v29 = vpop.f32.mrb[31].mxu0  ;;  %v1553_v48 = vsel %vm1059_vm2, %v1540_v47, -inf }
 0x68e   : > { %1554 = vmax.xlane.f32.xlu0 %v1553_v48 }
 0x6ec   : > { %v1546_v49 = vpop.xlane.xlu0 %1545 }
 0x6ed   : > { %v1556_v50 = vsub.f32 %v1486_v26, %v1546_v49 }
 0x6ee   : > { %v1549_v51 = vpop.xlane.xlu1 %1548 }
 0x6ef   : > { %v1560_v52 = vmul.f32 1.442695, %v1556_v50  ;;  %v1557_v53 = vsub.f32 %v1489_v33, %v1549_v51 }
 0x6f1   : > { %3208 = vpow2.f32 %v1560_v52  ;;  %v1562_v54 = vmul.f32 1.442695, %v1557_v53 }
 0x6f3   : > { %3210 = vpow2.f32 %v1562_v54 }
 0x6fb   : > { %v3209_v55 = vpop.eup %3208 }
 0x6fc   : > { %v1568_v56 = vsel %vm1059_vm2, %v3209_v55, 0.0 }
 0x6fd   : > { %v3211_v57 = vpop.eup %3210  ;;  %1569 = vadd.xlane.f32.xlu0 %v1568_v56 }
 0x6fe   : > { %v1571_v60 = vsel %vm1059_vm2, %v3211_v57, 0.0 }
 0x6ff   : > { %1572 = vadd.xlane.f32.xlu1 %v1571_v60 }
 0x710   : > { %1637 = vrot.lane.b32.xlu1 %v3536_v31, %s3288_s21 }
 0x714   : > { %1686 = vrot.lane.b32.xlu1 %v3485_v45, %s3289_s24 }
 0x717   : > { %v1552_v61 = vpop.xlane.xlu0 %1551 }
 0x718   : > { %v1558_v62 = vsub.f32 %v1537_v41, %v1552_v61 }
 0x71a   : > { %v1564_v63 = vmul.f32 1.442695, %v1558_v62 }
 0x71b   : > { %v1555_v0 = vpop.xlane.xlu0 %1554 }
 0x71c   : > { %3212 = vpow2.f32 %v1564_v63  ;;  %v1559_v1 = vsub.f32 %v1540_v47, %v1555_v0 }
 0x71e   : > { %v1566_v3 = vmul.f32 1.442695, %v1559_v1 }
 0x720   : > { %3214 = vpow2.f32 %v1566_v3 }
 0x726   : > { %v3213_v2 = vpop.eup %3212 }
 0x727   : > { %v1574_v4 = vsel %vm1059_vm2, %v3213_v2, 0.0 }
 0x728   : > { %1575 = vadd.xlane.f32.xlu0 %v1574_v4 }
 0x72a   : > { %v3215_v5 = vpop.eup %3214 }
 0x72b   : > { %v1577_v6 = vsel %vm1059_vm2, %v3215_v5, 0.0 }
 0x738   : > { %1578 = vadd.xlane.f32.xlu1 %v1577_v6 }
 0x73e   : > { %1590 = vrot.lane.b32.xlu0 %v3530_v44, %s3288_s21 }
 0x742   : > { %1684 = vrot.lane.b32.xlu0 %v3487_v46, %s3289_s24 }
 0x749   : > { %1737 = vrot.lane.b32.xlu1 %v3492_v58, %s3289_s24 }
 0x74d   : > { %1735 = vrot.lane.b32.xlu1 %v3494_v59, %s3289_s24 }
 0x78a   : > { %v1570_v8 = vpop.xlane.xlu0 %1569 }
 0x78c   : > { %v1573_v45 = vpop.xlane.xlu1 %1572 }
 0x78d   : > { %3216 = vrcp.f32 %v1573_v45 }
 0x78e   : > { %3218 = vrcp.f32 %v1570_v8 }
 0x790   : > { %v1638_v7 = vpop.permute.xlu1 %1637 }
 0x791   : > { %2969 = vmatpush3.bf16.msra.mxu0 %v1638_v7 }
 0x792   : > { %2980 = vmatprep.subr.bf16.mxu0 %v3285_v27 }
 0x794   : > { %v1687_v58 = vpop.permute.xlu1 %1686 }
 0x795   : > { %v1692_v59 = vsel %vm964_vm1, %v1687_v58, 0 }
 0x797   : > { %v3217_v9 = vpop.eup %3216 }
 0x798   : > { %v3219_v12 = vpop.eup %3218  ;;  %v1585_v14 = vmul.f32 %v3217_v9, %v3211_v57 }
 0x799   : > { %v1584_v15 = vmul.f32 %v3219_v12, %v3209_v55 }
 0x79b   : > { %v1588_v16 = vpack.c.bf16 %v1585_v14, %v1584_v15 }
 0x7b5   : > { %v1576_v10 = vpop.xlane.xlu0 %1575 }
 0x7b6   : > { %3220 = vrcp.f32 %v1576_v10 }
 0x7b9   : > { %v1591_v46 = vpop.permute.xlu0 %1590 }
 0x7ba   : > { %2963 = vmatpush3.bf16.msra.mxu1 %v1591_v46 }
 0x7bb   : > { %2974 = vmatprep.subr.bf16.mxu1 %v3285_v27 }
 0x7bd   : > { %2965 = vmatmul.mubr.msk.bf16.vlgmr.msra.gmra.mrb[20].mxu1 %vm1059_vm2, %v1588_v16  ;;  %v1685_v18 = vpop.permute.xlu0 %1684 }
 0x7be   : > { %2976 = vmatprep.mubr.msk.bf16.mxu1 %vm3286_vm0, %v3285_v27 }
 0x7c0   : > { %v3221_v20 = vpop.eup %3220 }
 0x7c1   : > { %v1586_v26 = vmul.f32 %v3221_v20, %v3213_v2 }
 0x7c3   : > { %2975 = vmatpush3.bf16.xpose.msra.mxu1 %v1692_v59 }
 0x7c4   : > { %2986 = vmatprep.subr.bf16.mxu1 %v3285_v27 }
 0x7c5   : > { %v1579_v17 = vpop.xlane.xlu1 %1578 }
 0x7c6   : > { %3222 = vrcp.f32 %v1579_v17 }
 0x7c9   : > { %v1738_v32 = vpop.permute.xlu1 %1737 }
 0x7ca   : > { %2977 = vmatmul.mubr.msk.bf16.vlgmr.msra.gmra.mrb[24].mxu1 %vm964_vm1, %v1685_v18  ;;  %v1743_v34 = vsel %vm964_vm1, %v1738_v32, 0 }
 0x7cb   : > { %2988 = vmatprep.mubr.msk.bf16.mxu1 %vm3286_vm0, %v3285_v27 }
 0x7cd   : > { %v1736_v35 = vpop.permute.xlu1 %1735 }
 0x7d0   : > { %v3223_v25 = vpop.eup %3222 }
 0x7d1   : > { %v1587_v30 = vmul.f32 %v3223_v25, %v3215_v5 }
 0x7d3   : > { %v1589_v33 = vpack.c.bf16 %v1587_v30, %v1586_v26 }
 0x7d5   : > { %2971 = vmatmul.mubr.msk.bf16.vlgmr.msra.gmra.mrb[32].mxu0 %vm1059_vm2, %v1589_v33 }
 0x7d6   : > { %2981 = vmatpush3.bf16.xpose.msra.mxu0 %v1743_v34  ;;  %2982 = vmatprep.mubr.msk.bf16.mxu0 %vm3286_vm0, %v3285_v27 }
 0x7d7   : > { %2992 = vmatprep.subr.bf16.mxu0 %v3285_v27 }
 0x7dd   : > { %2983 = vmatmul.mubr.msk.bf16.vlgmr.msra.gmra.mrb[36].mxu0 %vm964_vm1, %v1736_v35 }
 0x7de   : > { %2994 = vmatprep.mubr.msk.bf16.mxu0 %vm3286_vm0, %v3285_v27 }
 0x890   : > { %v1630_v37 = vpop.f32.mrb[20].mxu1 }
 0x891   : > { %v2966_v40 = vpop.f32.mrb[21].mxu1 }
 0x892   : > { %v1633_v41 = vpop.f32.mrb[22].mxu1  ;;  %v3153_v40 = vld [vmem:[%s3843_s19 + $0x8] sm:$0xff]  }
 0x893   : > { %v3100_v42 = vpack.i.bf16 %v1633_v41, %v1630_v37  ;;  %v2967_v43 = vpop.f32.mrb[23].mxu1  ;;  %v3152_v37 = vld [vmem:[%s3843_s19] sm:$0xff]   ;;  %v3154_v41 = vld [vmem:[%s3843_s19 + $0x10] sm:$0xff]  }
 0x894   : > { %v3156_v43 = vld [vmem:[%s3843_s19 + $0x20] sm:$0xff]  }
 0x89d   : > { %v1728_v47 = vpop.f32.mrb[24].mxu1 }
 0x89e   : > { %v2978_v29 = vpop.f32.mrb[25].mxu1  ;;  %v1786_v48 = vsel %vm1059_vm2, %v1728_v47, -inf }
 0x89f   : > { %1787 = vmax.xlane.f32.xlu0 %v1786_v48  ;;  %v1731_v49 = vpop.f32.mrb[26].mxu1  ;;  %v3158_v29 = vld [vmem:[%s3843_s19 + $0x30] sm:$0xff]  }
 0x8a0   : > { %v2979_v50 = vpop.f32.mrb[27].mxu1  ;;  %v1789_v51 = vsel %vm1059_vm2, %v1731_v49, -inf }
 0x8a1   : > { %1790 = vmax.xlane.f32.xlu1 %v1789_v51 }
 0x8a8   : > { %v1677_v52 = vpop.f32.mrb[32].mxu0 }
 0x8a9   : > { %v2972_v53 = vpop.f32.mrb[33].mxu0 }
 0x8aa   : > { %v1680_v54 = vpop.f32.mrb[34].mxu0  ;;  %v3159_v53 = vld [vmem:[%s3843_s19 + $0x38] sm:$0xff]  }
 0x8ab   : > { %v3105_v55 = vpack.i.bf16 %v1680_v54, %v1677_v52  ;;  %v2973_v56 = vpop.f32.mrb[35].mxu0 }
 0x8b0   : > { %v1779_v57 = vpop.f32.mrb[36].mxu0 }
 0x8b1   : > { %v2984_v60 = vpop.f32.mrb[37].mxu0  ;;  %v1792_v61 = vsel %vm1059_vm2, %v1779_v57, -inf }
 0x8b2   : > { %1793 = vmax.xlane.f32.xlu0 %v1792_v61  ;;  %v1782_v62 = vpop.f32.mrb[38].mxu0 }
 0x8b3   : > { %v2985_v63 = vpop.f32.mrb[39].mxu0  ;;  %v1795_v0 = vsel %vm1059_vm2, %v1782_v62, -inf }
 0x8b6   : > { %1796 = vmax.xlane.f32.xlu0 %v1795_v0 }
 0x92c   : > { %v1788_v1 = vpop.xlane.xlu0 %1787 }
 0x92d   : > { %v1798_v2 = vsub.f32 %v1728_v47, %v1788_v1  ;;  %v3157_v47 = vld [vmem:[%s3843_s19 + $0x28] sm:$0xff]  }
 0x92e   : > { %v1791_v3 = vpop.xlane.xlu1 %1790 }
 0x92f   : > { %v1802_v4 = vmul.f32 1.442695, %v1798_v2  ;;  %v1799_v5 = vsub.f32 %v1731_v49, %v1791_v3 }
 0x931   : > { %3224 = vpow2.f32 %v1802_v4  ;;  %v1804_v6 = vmul.f32 1.442695, %v1799_v5 }
 0x933   : > { %3226 = vpow2.f32 %v1804_v6 }
 0x93b   : > { %v3225_v45 = vpop.eup %3224 }
 0x93c   : > { %v1810_v7 = vsel %vm1059_vm2, %v3225_v45, 0.0 }
 0x93d   : > { %v3227_v8 = vpop.eup %3226  ;;  %1811 = vadd.xlane.f32.xlu0 %v1810_v7 }
 0x93e   : > { %v1813_v9 = vsel %vm1059_vm2, %v3227_v8, 0.0 }
 0x93f   : > { %1814 = vadd.xlane.f32.xlu1 %v1813_v9  ;;  %v1794_v10 = vpop.xlane.xlu0 %1793 }
 0x940   : > { %v1800_v12 = vsub.f32 %v1779_v57, %v1794_v10 }
 0x942   : > { %v1806_v14 = vmul.f32 1.442695, %v1800_v12 }
 0x943   : > { %v1797_v15 = vpop.xlane.xlu0 %1796 }
 0x944   : > { %3228 = vpow2.f32 %v1806_v14  ;;  %v1801_v46 = vsub.f32 %v1782_v62, %v1797_v15 }
 0x946   : > { %v1808_v16 = vmul.f32 1.442695, %v1801_v46 }
 0x948   : > { %3230 = vpow2.f32 %v1808_v16 }
 0x94e   : > { %v3229_v58 = vpop.eup %3228 }
 0x94f   : > { %v1816_v59 = vsel %vm1059_vm2, %v3229_v58, 0.0 }
 0x950   : > { %1817 = vadd.xlane.f32.xlu0 %v1816_v59 }
 0x952   : > { %v3231_v17 = vpop.eup %3230 }
 0x953   : > { %v1819_v18 = vsel %vm1059_vm2, %v3231_v17, 0.0 }
 0x954   : > { %1820 = vadd.xlane.f32.xlu1 %v1819_v18 }
 0x965   : > { %1879 = vrot.lane.b32.xlu1 %v3536_v31, %s3289_s24 }
 0x966   : > { %1832 = vrot.lane.b32.xlu0 %v3530_v44, %s3289_s24 }
 0x969   : > { %3091 = vrot.lane.b32.xlu1 %v3090_v24, %s3289_s24 }
 0x96a   : > { %3101 = vrot.lane.b32.xlu0 %v3100_v42, %s3288_s21  ;;  %v3155_v42 = vld [vmem:[%s3843_s19 + $0x18] sm:$0xff]  }
 0x96d   : > { %3096 = vrot.lane.b32.xlu1 %v3095_v39, %s3289_s24 }
 0x971   : > { %3106 = vrot.lane.b32.xlu1 %v3105_v55, %s3288_s21  ;;  %s3847_s21 = scalar_lea.vmem %s3820_s8, %s3382_s29 }
 0x9ca   : > { %v1812_v25 = vpop.xlane.xlu0 %1811 }
 0x9cc   : > { %v1815_v20 = vpop.xlane.xlu1 %1814 }
 0x9cd   : > { %3232 = vrcp.f32 %v1815_v20 }
 0x9ce   : > { %3234 = vrcp.f32 %v1812_v25 }
 0x9d7   : > { %v3233_v31 = vpop.eup %3232 }
 0x9d8   : > { %v3235_v26 = vpop.eup %3234  ;;  %v1827_v30 = vmul.f32 %v3233_v31, %v3227_v8 }
 0x9d9   : > { %v1826_v19 = vmul.f32 %v3235_v26, %v3225_v45 }
 0x9db   : > { %v1830_v36 = vpack.c.bf16 %v1827_v30, %v1826_v19 }
 0x9dd   : > { %v1818_v44 = vpop.xlane.xlu0 %1817 }
 0x9de   : > { %3236 = vrcp.f32 %v1818_v44 }
 0x9e1   : > { %v1821_v22 = vpop.xlane.xlu1 %1820  ;;  %v1833_v24 = vpop.permute.xlu0 %1832 }
 0x9e2   : > { %3238 = vrcp.f32 %v1821_v22  ;;  %2987 = vmatpush3.bf16.msra.mxu1 %v1833_v24 }
 0x9e3   : > { %2998 = vmatprep.subr.bf16.mxu1 %v3152_v37 }
 0x9e5   : > { %v1880_v38 = vpop.permute.xlu1 %1879  ;;  %2989 = vmatmul.mubr.msk.bf16.vlgmr.msra.gmra.mrb[28].mxu1 %vm1059_vm2, %v1830_v36  ;;  %v3102_v0 = vpop.permute.xlu0 %3101 }
 0x9e6   : > { %2993 = vmatpush3.bf16.msra.mxu0 %v1880_v38  ;;  %2999 = vmatpush3.bf16.msra.mxu1 %v3152_v37  ;;  %v3104_v3 = vunpack.i.h.bf16 %v3102_v0  ;;  %v3103_v4 = vunpack.i.l.bf16 %v3102_v0 }
 0x9e7   : > { %3000 = vmatprep.subr.bf16.mxu1 %v3153_v40 }
 0x9e8   : > { %v3237_v39 = vpop.eup %3236 }
 0x9e9   : > { %v1828_v33 = vmul.f32 %v3237_v39, %v3229_v58  ;;  %v3092_v61 = vpop.permute.xlu1 %3091 }
 0x9ea   : > { %3001 = vmatpush3.bf16.msra.mxu1 %v3153_v40  ;;  %v3094_v62 = vunpack.i.h.bf16 %v3092_v61  ;;  %v3093_v63 = vunpack.i.l.bf16 %v3092_v61  ;;  %v3258_v40 = vld [vmem:[#allocation2 + $0x10] sm:$0xff] }
 0x9eb   : > { %3002 = vmatprep.subr.bf16.mxu1 %v3154_v41 }
 0x9ec   : > { %v3239_v32 = vpop.eup %3238  ;;  %v1975_v1 = vsel %vm964_vm1, %v3563_v13, %v3094_v62  ;;  %v1974_v2 = vsel %vm964_vm1, %v3561_v11, %v3093_v63 }
 0x9ed   : > { %v1829_v34 = vmul.f32 %v3239_v32, %v3231_v17  ;;  %v3097_v6 = vpop.permute.xlu1 %3096  ;;  %v1979_v8 = vsel %vm1978_vm3, %v1974_v2, %v3103_v4  ;;  %v1980_v9 = vsel %vm1978_vm3, %v1975_v1, %v3104_v3  ;;  %v3256_v32 = vld [vmem:[#allocation2] sm:$0xff] }
 0x9ee   : > { %3003 = vmatpush3.bf16.msra.mxu1 %v3154_v41  ;;  %v3099_v11 = vunpack.i.h.bf16 %v3097_v6  ;;  %v3098_v15 = vunpack.i.l.bf16 %v3097_v6  ;;  %v3162_v6 = vld [vmem:[%s3417_s20 + $0x10] sm:$0xff]  }
 0x9ef   : > { %v1831_v35 = vpack.c.bf16 %v1829_v34, %v1828_v33  ;;  %3004 = vmatprep.subr.bf16.mxu1 %v3155_v42  ;;  %v3257_v34 = vld [vmem:[#allocation2 + $0x8] sm:$0xff] }
 0x9f0   : > { %v1977_v59 = vsel %vm964_vm1, %v3569_v23, %v3099_v11  ;;  %v1976_v17 = vsel %vm964_vm1, %v3567_v21, %v3098_v15  ;;  %v2770_v23 = vld [vmem:[%s3844_s23] ss:$0 sm:$0xff]  ;;  %v3171_v11 = vld [vmem:[%s3426_s15 + $0x18] sm:$0xff]  }
 0x9f1   : > { %2995 = vmatmul.mubr.msk.bf16.vlgmr.msra.gmra.mrb[40].mxu0 %vm1059_vm2, %v1831_v35  ;;  %v3107_v14 = vpop.permute.xlu1 %3106  ;;  %v3172_v15 = vld [vmem:[%s3426_s15 + $0x20] sm:$0xff]  }
 0x9f2   : > { %3005 = vmatpush3.bf16.msra.mxu1 %v3155_v42  ;;  %v3109_v46 = vunpack.i.h.bf16 %v3107_v14  ;;  %v3108_v16 = vunpack.i.l.bf16 %v3107_v14  ;;  %v3259_v42 = vld [vmem:[#allocation2 + $0x18] sm:$0xff]  ;;  %v3170_v14 = vld [vmem:[%s3426_s15 + $0x10] sm:$0xff]  }
 0x9f3   : > { %3006 = vmatprep.subr.bf16.mxu1 %v3156_v43 }
 0x9f4   : > { %v1981_v25 = vsel %vm1978_vm3, %v1976_v17, %v3108_v16  ;;  %v1982_v31 = vsel %vm1978_vm3, %v1977_v59, %v3109_v46  ;;  %v3173_v46 = vld [vmem:[%s3426_s15 + $0x28] sm:$0xff]  }
 0x9f6   : > { %3007 = vmatpush3.bf16.msra.mxu1 %v3156_v43 }
 0x9f7   : > { %3008 = vmatprep.subr.bf16.mxu1 %v3157_v47 }
 0x9fa   : > { %3009 = vmatpush3.bf16.msra.mxu1 %v3157_v47  ;;  %v3160_v47 = vld [vmem:[%s3417_s20] sm:$0xff]  }
 0x9fb   : > { %3010 = vmatprep.subr.bf16.mxu1 %v3158_v29  ;;  %3018 = vmatprep.subr.bf16.mxu0 %v3160_v47 }
 0x9fc   : > { %3019 = vmatpush3.bf16.msra.mxu0 %v3160_v47 }
 0x9fe   : > { %3011 = vmatpush3.bf16.msra.mxu1 %v3158_v29  ;;  %v2111_v29 = vand.u32 127, %v709_v28 }
 0x9ff   : > { %3012 = vmatprep.subr.bf16.mxu1 %v3159_v53 }
 0xa00   : > { %vm2112_vm5 = vcmp.lt.s32.totalorder %v2111_v29, 32 }
 0xa02   : > { %3013 = vmatpush3.bf16.msra.mxu1 %v3159_v53 }
 0xab8   : > { %v1872_v48 = vpop.f32.mrb[28].mxu1 }
 0xab9   : > { %v2990_v49 = vpop.f32.mrb[29].mxu1 }
 0xaba   : > { %v1875_v50 = vpop.f32.mrb[30].mxu1 }
 0xabb   : > { %v3110_v51 = vpack.i.bf16 %v1875_v50, %v1872_v48  ;;  %v2991_v52 = vpop.f32.mrb[31].mxu1 }
 0xabd   : > { %3111 = vrot.lane.b32.xlu0 %v3110_v51, %s3287_s27  ;;  %v3715_v51 = vsel %vm2112_vm5, 1.0, %v3285_v27 }
 0xac4   : > { %v1919_v54 = vpop.f32.mrb[40].mxu0 }
 0xac5   : > { %v2996_v55 = vpop.f32.mrb[41].mxu0 }
 0xac6   : > { %v1922_v56 = vpop.f32.mrb[42].mxu0 }
 0xac7   : > { %v3115_v57 = vpack.i.bf16 %v1922_v56, %v1919_v54  ;;  %v2997_v60 = vpop.f32.mrb[43].mxu0 }
 0xac9   : > { %3116 = vrot.lane.b32.xlu1 %v3115_v57, %s3287_s27 }
 0xb2f   : > { %v3112_v5 = vpop.permute.xlu0 %3111 }
 0xb30   : > { %v3114_v45 = vunpack.i.h.bf16 %v3112_v5  ;;  %v3113_v7 = vunpack.i.l.bf16 %v3112_v5  ;;  %v3161_v5 = vld [vmem:[%s3417_s20 + $0x8] sm:$0xff]  }
 0xb31   : > { %3020 = vmatprep.subr.bf16.mxu0 %v3161_v5 }
 0xb32   : > { %v1984_v10 = vsel %vm1983_vm4, %v1979_v8, %v3113_v7  ;;  %v1985_v12 = vsel %vm1983_vm4, %v1980_v9, %v3114_v45  ;;  %3021 = vmatpush3.bf16.msra.mxu0 %v3161_v5  ;;  %v3163_v45 = vld [vmem:[%s3417_s20 + $0x18] sm:$0xff]   ;;  %v3164_v7 = vld [vmem:[%s3417_s20 + $0x20] sm:$0xff]   ;;  %v3165_v8 = vld [vmem:[%s3417_s20 + $0x28] sm:$0xff]  }
 0xb33   : > { %v1988_v13 = vpack.c.bf16 %v1985_v12, %v1984_v10  ;;  %3022 = vmatprep.subr.bf16.mxu0 %v3162_v6  ;;  %v3166_v9 = vld [vmem:[%s3417_s20 + $0x30] sm:$0xff]   ;;  %v3167_v10 = vld [vmem:[%s3417_s20 + $0x38] sm:$0xff]   ;;  %v3168_v12 = vld [vmem:[%s3426_s15] sm:$0xff]  }
 0xb34   : > { %3038 = vmatprep.subr.bf16.mxu1 %v3168_v12 }
 0xb35   : > { %3014 = vmatprep.mubr.bf16.mxu1 %v1988_v13  ;;  %v3169_v13 = vld [vmem:[%s3426_s15 + $0x8] sm:$0xff]  }
 0xb36   : > { %3023 = vmatpush3.bf16.msra.mxu0 %v3162_v6 }
 0xb37   : > { %3024 = vmatprep.subr.bf16.mxu0 %v3163_v45 }
 0xb3a   : > { %3025 = vmatpush3.bf16.msra.mxu0 %v3163_v45 }
 0xb3b   : > { %v3117_v58 = vpop.permute.xlu1 %3116  ;;  %3026 = vmatprep.subr.bf16.mxu0 %v3164_v7 }
 0xb3c   : > { %v3119_v18 = vunpack.i.h.bf16 %v3117_v58  ;;  %v3118_v20 = vunpack.i.l.bf16 %v3117_v58 }
 0xb3e   : > { %v1987_v44 = vsel %vm1983_vm4, %v1982_v31, %v3119_v18  ;;  %v1986_v26 = vsel %vm1983_vm4, %v1981_v25, %v3118_v20  ;;  %3027 = vmatpush3.bf16.msra.mxu0 %v3164_v7 }
 0xb3f   : > { %v1989_v30 = vpack.c.bf16 %v1987_v44, %v1986_v26  ;;  %3028 = vmatprep.subr.bf16.mxu0 %v3165_v8 }
 0xb41   : > { %3015 = vmatmul.mubr.bf16.vlgmr.msra.gmra.mrb[32].mxu1 %v1989_v30 }
 0xb42   : > { %3029 = vmatpush3.bf16.msra.mxu0 %v3165_v8  ;;  %3039 = vmatpush3.bf16.msra.mxu1 %v3168_v12 }
 0xb43   : > { %3030 = vmatprep.subr.bf16.mxu0 %v3166_v9  ;;  %3040 = vmatprep.subr.bf16.mxu1 %v3169_v13 }
 0xb46   : > { %3031 = vmatpush3.bf16.msra.mxu0 %v3166_v9  ;;  %3041 = vmatpush3.bf16.msra.mxu1 %v3169_v13 }
 0xb47   : > { %3032 = vmatprep.subr.bf16.mxu0 %v3167_v10  ;;  %3042 = vmatprep.subr.bf16.mxu1 %v3170_v14 }
 0xb4a   : > { %3033 = vmatpush3.bf16.msra.mxu0 %v3167_v10  ;;  %3043 = vmatpush3.bf16.msra.mxu1 %v3170_v14 }
 0xb4b   : > { %3044 = vmatprep.subr.bf16.mxu1 %v3171_v11 }
 0xb4e   : > { %3045 = vmatpush3.bf16.msra.mxu1 %v3171_v11 }
 0xb4f   : > { %3046 = vmatprep.subr.bf16.mxu1 %v3172_v15 }
 0xb52   : > { %3047 = vmatpush3.bf16.msra.mxu1 %v3172_v15 }
 0xb53   : > { %3048 = vmatprep.subr.bf16.mxu1 %v3173_v46 }
 0xb56   : > { %3049 = vmatpush3.bf16.msra.mxu1 %v3173_v46 }
 0xc14   : > { %v3016_v19 = vpop.f32.mrb[32].mxu1 }
 0xc15   : > { %v2095_v22 = vpop.f32.mrb[33].mxu1  ;;  %v2104_v38 = vadd.f32 %v3016_v19, %v2770_v23 }
 0xc16   : > { %v2096_v21 = vadd.f32 %v2770_v23, %v2095_v22  ;;  %v3017_v24 = vpop.f32.mrb[34].mxu1  ;;  %v2780_v22 = vld [vmem:[%s3845_s14] ss:$0 sm:$0xff] }
 0xc17   : > { %v2098_v36 = vpop.f32.mrb[35].mxu1  ;;  %v2107_v37 = vadd.f32 %v3017_v24, %v2770_v23  ;;  %v2117_v41 = vadd.f32 %v3258_v40, %v2104_v38 }
 0xc18   : > { %v2099_v39 = vadd.f32 %v2770_v23, %v2098_v36  ;;  %v2115_v33 = vadd.f32 %v3256_v32, %v2096_v21  ;;  %v2781_v32 = vld [vmem:[%s3846_s3] ss:$0 sm:$0xff] }
 0xc19   : > { %v2118_v43 = vadd.f32 %v3259_v42, %v2107_v37 }
 0xc1a   : > { %2121 = vadd.xlane.f32.xlu0 %v2115_v33  ;;  %v2116_v35 = vadd.f32 %v3257_v34, %v2099_v39 }
 0xc1c   : > { %2123 = vadd.xlane.f32.xlu1 %v2116_v35 }
 0xc1e   : > { %2125 = vadd.xlane.f32.xlu0 %v2117_v41 }
 0xc22   : > { %2127 = vadd.xlane.f32.xlu0 %v2118_v43 }
 0xca7   : > { %v2122_v48 = vpop.xlane.xlu0 %2121 }
 0xca8   : > { %v2129_v49 = vmul.f32 0.03125, %v2122_v48 }
 0xca9   : > { %v2124_v50 = vpop.xlane.xlu1 %2123 }
 0xcaa   : > { %v2133_v52 = vsub.f32 %v2115_v33, %v2129_v49  ;;  %v2130_v53 = vmul.f32 0.03125, %v2124_v50  ;;  %v3174_v50 = vld [vmem:[%s3426_s15 + $0x30] sm:$0xff]  }
 0xcab   : > { %v2126_v54 = vpop.xlane.xlu0 %2125  ;;  %3050 = vmatprep.subr.bf16.mxu1 %v3174_v50 }
 0xcac   : > { %v2134_v55 = vsub.f32 %v2116_v35, %v2130_v53  ;;  %v2131_v56 = vmul.f32 0.03125, %v2126_v54  ;;  %v3718_v57 = vmul.f32 %v3715_v51, %v2133_v52  ;;  %3051 = vmatpush3.bf16.msra.mxu1 %v3174_v50  ;;  %v3175_v52 = vld [vmem:[%s3426_s15 + $0x38] sm:$0xff]   ;;  %v2782_v53 = vld [vmem:[%s3847_s21] ss:$0 sm:$0xff] }
 0xcad   : > { %3052 = vmatprep.subr.bf16.mxu1 %v3175_v52 }
 0xcae   : > { %v2135_v60 = vsub.f32 %v2117_v41, %v2131_v56  ;;  %v2141_v28 = vmul.f32 %v3718_v57, %v3718_v57  ;;  %v3723_v61 = vmul.f32 %v3715_v51, %v2134_v55 }
 0xcaf   : > { %v2128_v62 = vpop.xlane.xlu0 %2127 }
 0xcb0   : > { %v2132_v27 = vmul.f32 0.03125, %v2128_v62  ;;  %2145 = vadd.xlane.f32.xlu0 %v2141_v28  ;;  %v2142_v63 = vmul.f32 %v3723_v61, %v3723_v61  ;;  %v3728_v0 = vmul.f32 %v3715_v51, %v2135_v60  ;;  %3053 = vmatpush3.bf16.msra.mxu1 %v3175_v52 }
 0xcb2   : > { %v2136_v1 = vsub.f32 %v2118_v43, %v2132_v27  ;;  %2147 = vadd.xlane.f32.xlu1 %v2142_v63  ;;  %v2143_v2 = vmul.f32 %v3728_v0, %v3728_v0 }
 0xcb4   : > { %2149 = vadd.xlane.f32.xlu0 %v2143_v2  ;;  %v3733_v3 = vmul.f32 %v3715_v51, %v2136_v1 }
 0xcb6   : > { %v2144_v4 = vmul.f32 %v3733_v3, %v3733_v3 }
 0xcb8   : > { %2151 = vadd.xlane.f32.xlu1 %v2144_v4  ;;  %v2791_v4 = vld [vmem:[%s642_s16] ss:$0 sm:$0xff] }
 0xd3d   : > { %v2146_v16 = vpop.xlane.xlu0 %2145 }
 0xd3e   : > { %v2153_v58 = vmul.f32 0.03125, %v2146_v16 }
 0xd3f   : > { %v2148_v59 = vpop.xlane.xlu1 %2147 }
 0xd40   : > { %v2157_v17 = vadd.f32 1e-05, %v2153_v58  ;;  %v2154_v18 = vmul.f32 0.03125, %v2148_v59 }
 0xd41   : > { %v2150_v20 = vpop.xlane.xlu0 %2149 }
 0xd42   : > { %3240 = vrsqrt.f32 %v2157_v17  ;;  %v2158_v25 = vadd.f32 1e-05, %v2154_v18  ;;  %v2155_v31 = vmul.f32 0.03125, %v2150_v20 }
 0xd44   : > { %3242 = vrsqrt.f32 %v2158_v25  ;;  %v2159_v44 = vadd.f32 1e-05, %v2155_v31 }
 0xd45   : > { %v2152_v26 = vpop.xlane.xlu1 %2151 }
 0xd46   : > { %3244 = vrsqrt.f32 %v2159_v44  ;;  %v2156_v30 = vmul.f32 0.03125, %v2152_v26 }
 0xd48   : > { %v2160_v23 = vadd.f32 1e-05, %v2156_v30 }
 0xd4a   : > { %3246 = vrsqrt.f32 %v2160_v23 }
 0xd4c   : > { %v3241_v19 = vpop.eup %3240 }
 0xd4d   : > { %v2165_v21 = vmul.f32 %v3241_v19, %v3718_v57 }
 0xd4e   : > { %v3243_v24 = vpop.eup %3242 }
 0xd4f   : > { %v2166_v36 = vmul.f32 %v3243_v24, %v3723_v61  ;;  %v2175_v38 = vmul.f32 %v2780_v22, %v2165_v21 }
 0xd50   : > { %v3245_v39 = vpop.eup %3244 }
 0xd51   : > { %v2167_v33 = vmul.f32 %v3245_v39, %v3728_v0  ;;  %v2176_v34 = vmul.f32 %v2780_v22, %v2166_v36  ;;  %v2185_v35 = vadd.f32 %v2781_v32, %v2175_v38 }
 0xd53   : > { %v2186_v37 = vadd.f32 %v2781_v32, %v2176_v34  ;;  %v2177_v43 = vmul.f32 %v2780_v22, %v2167_v33 }
 0xd54   : > { %v3247_v40 = vpop.eup %3246 }
 0xd55   : > { %v2168_v41 = vmul.f32 %v3247_v40, %v3733_v3  ;;  %v2189_v42 = vpack.c.bf16 %v2186_v37, %v2185_v35  ;;  %v2187_v29 = vadd.f32 %v2781_v32, %v2177_v43 }
 0xd57   : > { %3034 = vmatprep.mubr.bf16.mxu0 %v2189_v42  ;;  %v2178_v47 = vmul.f32 %v2780_v22, %v2168_v41 }
 0xd59   : > { %v2188_v48 = vadd.f32 %v2781_v32, %v2178_v47 }
 0xd5b   : > { %v2190_v49 = vpack.c.bf16 %v2188_v48, %v2187_v29 }
 0xd5d   : > { %3035 = vmatmul.mubr.bf16.vlgmr.msra.gmra.mrb[44].mxu0 %v2190_v49  ;;  %v2800_v49 = vld [vmem:[%s645_s18] ss:$0 sm:$0xff]  ;;  %s3848_s18 = sld [smem:[#allocation10_spill]] (!%p2802_p6) }
 0xe30   : > { %v3036_v54 = vpop.f32.mrb[44].mxu0 }
 0xe31   : > { %v2305_v55 = vadd.f32 %v3036_v54, %v2782_v53  ;;  %v2296_v56 = vpop.f32.mrb[45].mxu0 }
 0xe32   : > { %v2297_v57 = vadd.f32 %v2782_v53, %v2296_v56  ;;  %v3037_v60 = vpop.f32.mrb[46].mxu0 }
 0xe33   : > { %v2308_v28 = vadd.f32 %v3037_v60, %v2782_v53  ;;  %v2299_v61 = vpop.f32.mrb[47].mxu0  ;;  %v2313_v27 = vmax.f32 %v2305_v55, 0.0 }
 0xe34   : > { %v2300_v62 = vadd.f32 %v2782_v53, %v2299_v61  ;;  %v2311_v0 = vmax.f32 %v2297_v57, 0.0  ;;  %v2801_v53 = vld [vmem:[%s648_s1] ss:$0 sm:$0xff] }
 0xe35   : > { %v2314_v63 = vmax.f32 %v2308_v28, 0.0 }
 0xe36   : > { %v2312_v1 = vmax.f32 %v2300_v62, 0.0 }
 0xe37   : > { %v2316_v2 = vpack.c.bf16 %v2314_v63, %v2313_v27 }
 0xe38   : > { %v2315_v3 = vpack.c.bf16 %v2312_v1, %v2311_v0 }
 0xe3a   : > { %3054 = vmatprep.mubr.bf16.mxu1 %v2315_v3 }
 0xe3b   : > { %3055 = vmatmul.mubr.bf16.vlgmr.msra.gmra.mrb[36].mxu1 %v2316_v2 }
 0xf0e   : > { %v3056_v5 = vpop.f32.mrb[36].mxu1 }
 0xf0f   : > { %v2422_v6 = vpop.f32.mrb[37].mxu1  ;;  %v2431_v9 = vadd.f32 %v3056_v5, %v2791_v4 }
 0xf10   : > { %v2423_v45 = vadd.f32 %v2791_v4, %v2422_v6  ;;  %v3057_v7 = vpop.f32.mrb[38].mxu1 }
 0xf11   : > { %v2425_v8 = vpop.f32.mrb[39].mxu1  ;;  %v2434_v13 = vadd.f32 %v3057_v7, %v2791_v4  ;;  %v2439_v11 = vadd.f32 %v2431_v9, %v2187_v29 }
 0xf12   : > { %v2426_v10 = vadd.f32 %v2791_v4, %v2425_v8  ;;  %v2437_v12 = vadd.f32 %v2423_v45, %v2185_v35 }
 0xf13   : > { %v2440_v15 = vadd.f32 %v2434_v13, %v2188_v48 }
 0xf14   : > { %2443 = vadd.xlane.f32.xlu0 %v2437_v12  ;;  %v2438_v14 = vadd.f32 %v2426_v10, %v2186_v37 }
 0xf16   : > { %2445 = vadd.xlane.f32.xlu1 %v2438_v14 }
 0xf18   : > { %2447 = vadd.xlane.f32.xlu0 %v2439_v11 }
 0xf1a   : > { %2449 = vadd.xlane.f32.xlu1 %v2440_v15 }
 0xfa1   : > { %v2444_v46 = vpop.xlane.xlu0 %2443 }
 0xfa2   : > { %v2451_v16 = vmul.f32 0.03125, %v2444_v46 }
 0xfa3   : > { %v2446_v58 = vpop.xlane.xlu1 %2445 }
 0xfa4   : > { %v2455_v59 = vsub.f32 %v2437_v12, %v2451_v16  ;;  %v2452_v17 = vmul.f32 0.03125, %v2446_v58 }
 0xfa5   : > { %v2448_v18 = vpop.xlane.xlu0 %2447 }
 0xfa6   : > { %v2456_v20 = vsub.f32 %v2438_v14, %v2452_v17  ;;  %v2453_v25 = vmul.f32 0.03125, %v2448_v18  ;;  %v2459_v31 = vmul.f32 %v3715_v51, %v2455_v59 }
 0xfa7   : > { %v2450_v44 = vpop.xlane.xlu1 %2449 }
 0xfa8   : > { %v2457_v26 = vsub.f32 %v2439_v11, %v2453_v25  ;;  %v2454_v30 = vmul.f32 0.03125, %v2450_v44  ;;  %v2463_v23 = vmul.f32 %v2459_v31, %v2459_v31  ;;  %v2460_v19 = vmul.f32 %v3715_v51, %v2456_v20 }
 0xfaa   : > { %v2458_v22 = vsub.f32 %v2440_v15, %v2454_v30  ;;  %2467 = vadd.xlane.f32.xlu0 %v2463_v23  ;;  %v2464_v21 = vmul.f32 %v2460_v19, %v2460_v19  ;;  %v2461_v24 = vmul.f32 %v3715_v51, %v2457_v26 }
 0xfac   : > { %2469 = vadd.xlane.f32.xlu1 %v2464_v21  ;;  %v2465_v36 = vmul.f32 %v2461_v24, %v2461_v24  ;;  %v2462_v38 = vmul.f32 %v3715_v51, %v2458_v22 }
 0xfae   : > { %2471 = vadd.xlane.f32.xlu0 %v2465_v36  ;;  %v2466_v39 = vmul.f32 %v2462_v38, %v2462_v38 }
 0xfb0   : > { %2473 = vadd.xlane.f32.xlu1 %v2466_v39 }
0x1037   : > { %v2468_v32 = vpop.xlane.xlu0 %2467 }
0x1038   : > { %v2475_v33 = vmul.f32 0.03125, %v2468_v32 }
0x1039   : > { %v2470_v34 = vpop.xlane.xlu1 %2469 }
0x103a   : > { %v2479_v35 = vadd.f32 1e-05, %v2475_v33  ;;  %v2476_v37 = vmul.f32 0.03125, %v2470_v34 }
0x103b   : > { %v2472_v40 = vpop.xlane.xlu0 %2471 }
0x103c   : > { %3248 = vrsqrt.f32 %v2479_v35  ;;  %v2480_v41 = vadd.f32 1e-05, %v2476_v37  ;;  %v2477_v42 = vmul.f32 0.03125, %v2472_v40 }
0x103d   : > { %v2474_v43 = vpop.xlane.xlu1 %2473 }
0x103e   : > { %3250 = vrsqrt.f32 %v2480_v41  ;;  %v2481_v47 = vadd.f32 1e-05, %v2477_v42  ;;  %v2478_v29 = vmul.f32 0.03125, %v2474_v43 }
0x1040   : > { %3252 = vrsqrt.f32 %v2481_v47  ;;  %v2482_v51 = vadd.f32 1e-05, %v2478_v29 }
0x1042   : > { %3254 = vrsqrt.f32 %v2482_v51 }
0x1046   : > { %v3249_v48 = vpop.eup %3248 }
0x1047   : > { %v2487_v50 = vmul.f32 %v3249_v48, %v2459_v31 }
0x1048   : > { %v3251_v52 = vpop.eup %3250 }
0x1049   : > { %v2497_v54 = vmul.f32 %v2800_v49, %v2487_v50  ;;  %v2488_v55 = vmul.f32 %v3251_v52, %v2460_v19 }
0x104a   : > { %v3253_v56 = vpop.eup %3252 }
0x104b   : > { %v2507_v57 = vadd.f32 %v2801_v53, %v2497_v54  ;;  %v2498_v60 = vmul.f32 %v2800_v49, %v2488_v55  ;;  %v2489_v28 = vmul.f32 %v3253_v56, %v2461_v24 }
0x104c   : > { %v3255_v61 = vpop.eup %3254 }
0x104d   : > { %2511 = vst [vmem:[#allocation2] sm:$0xff] %v2507_v57  ;;  %v2508_v62 = vadd.f32 %v2801_v53, %v2498_v60  ;;  %v2499_v27 = vmul.f32 %v2800_v49, %v2489_v28  ;;  %v2490_v63 = vmul.f32 %v3255_v61, %v2462_v38  ;;  %2518 = sbr.rel (%p2802_p6) target bundleno = 4188 (0x105c), region = 80 }
0x104f   : > { %2512 = vst [vmem:[#allocation2 + $0x8] sm:$0xff] %v2508_v62  ;;  %v2509_v0 = vadd.f32 %v2801_v53, %v2499_v27  ;;  %v2500_v1 = vmul.f32 %v2800_v49, %v2490_v63 }
0x1051   : > { %2513 = vst [vmem:[#allocation2 + $0x10] sm:$0xff] %v2509_v0  ;;  %v2510_v2 = vadd.f32 %v2801_v53, %v2500_v1 }
0x1053   : > { %2514 = vst [vmem:[#allocation2 + $0x18] sm:$0xff] %v2510_v2 }
0x1054   : > { %v2519_v3 = vld [vmem:[#allocation2] sm:$0xff] }
0x1055   : > { %2523 = vst [vmem:[%s3848_s18] sm:$0xff] %v2519_v3 }
0x1056   : > { %v2520_v4 = vld [vmem:[#allocation2 + $0x8] sm:$0xff] }
0x1057   : > { %2524 = vst [vmem:[%s3848_s18 + $0x8] sm:$0xff] %v2520_v4 }
0x1058   : > { %v2521_v5 = vld [vmem:[#allocation2 + $0x10] sm:$0xff] }
0x1059   : > { %2525 = vst [vmem:[%s3848_s18 + $0x10] sm:$0xff] %v2521_v5 }
0x105a   : > { %v2522_v6 = vld [vmem:[#allocation2 + $0x18] sm:$0xff] }
0x105b   : > { %2526 = vst [vmem:[%s3848_s18 + $0x18] sm:$0xff] %v2522_v6 }
0x105c PF: > { %s3849_s25 = sld [smem:[#allocation4_spill]]  ;;  %s3851_s26 = sld [smem:[#allocation5_spill]] }
0x1062   : > { %s23_s27 = sadd.s32 1, %s3849_s25   ;;  %s3850_s25 = sld [smem:[#allocation3_spill]] }
0x1063   : > { %p20_p7 = scmp.ge.s32.totalorder %s23_s27, 4  }
0x1065   :  { %22 = sbr.rel (!%p20_p7) target bundleno = 5 (0x5), region = 146 }

</bundles_post_ra>
